<compile_context>
chip_gen: v5e
topology: v5e:2x2
jax: 0.10.0
libtpu: 0.0.40
codegen_flags: <defaults>
</compile_context>

<pallas_src>
import jax
import jax.numpy as jnp
import numpy as np
from jax.experimental import pallas as pl
from jax.experimental.pallas import tpu as pltpu


def bottleneck_kernel(x_ref, w1_ref, b1_ref, w2_ref, b2_ref, w3_ref, b3_ref,
                      o_ref, pad_ref):
    """One grid step processes one image of the batch.

    x_ref : (1, H, W, Cin)  f32   input tile (NHWC)
    w1_ref: (Cin, width)    bf16  1x1 conv weight, BN1 scale folded in
    b1_ref: (1, width)      f32   BN1 bias
    w2_ref: (3, 3*width, width) bf16  3x3 conv weight, [dy] x (dx,cin) x cout,
                                       BN2 scale folded in
    b2_ref: (1, width)      f32   BN2 bias
    w3_ref: (width, Cout)   bf16  1x1 conv weight, BN3 scale folded in
    b3_ref: (1, Cout)       f32   BN3 bias
    o_ref : (1, H, W, Cout) f32   output tile (NHWC)
    pad_ref: (H+2, W, 3*width) bf16 scratch: H-padded, dx-concatenated planes
    """
    H, W, Cin = x_ref.shape[1], x_ref.shape[2], x_ref.shape[3]
    width = w1_ref.shape[1]
    Cout = w3_ref.shape[1]
    HW = H * W

    x = x_ref[0]                             # (H, W, Cin) f32 (kept for residual)
    x2d = x.reshape(HW, Cin)

    # ---- conv1 (1x1) + bn1 + relu  (bf16 MXU, f32 epilogue) -------------
    t1 = jnp.dot(x2d.astype(jnp.bfloat16), w1_ref[...],
                 preferred_element_type=jnp.float32)
    t1 = jnp.maximum(t1 + b1_ref[...], 0.0)                 # (HW, width) f32
    t1 = t1.reshape(H, W, width).astype(jnp.bfloat16)

    # ---- build the 3 dx-shifted planes ONCE, concat on the lane axis ----
    zcol = jnp.zeros((H, 1, width), jnp.bfloat16)
    left = jnp.concatenate([zcol, t1[:, :W - 1, :]], axis=1)   # value at w-1
    right = jnp.concatenate([t1[:, 1:, :], zcol], axis=1)      # value at w+1
    dx_cat = jnp.concatenate([left, t1, right], axis=-1)       # (H, W, 3*width)

    # H-padded scratch: zero only the two halo rows, write the interior.
    pad_ref[0] = jnp.zeros((W, 3 * width), jnp.bfloat16)
    pad_ref[H + 1] = jnp.zeros((W, 3 * width), jnp.bfloat16)
    pad_ref[1:H + 1] = dx_cat

    # ---- conv2 (3x3, stride=1, pad=1) + bn2 + relu ----------------------
    # Three deep matmuls (K = 3*width); dy taps are free leading-dim slices.
    acc = jnp.zeros((HW, width), jnp.float32)
    for dy in range(3):
        window = pad_ref[dy:dy + H].reshape(HW, 3 * width)
        acc = acc + jnp.dot(window, w2_ref[dy],
                            preferred_element_type=jnp.float32)
    t2 = jnp.maximum(acc + b2_ref[...], 0.0)                  # (HW, width) f32

    # ---- conv3 (1x1) + bn3 + residual add + relu, single fused store ----
    t3 = jnp.dot(t2.astype(jnp.bfloat16), w3_ref[...],
                 preferred_element_type=jnp.float32)
    out = jnp.maximum(t3 + b3_ref[...] + x2d, 0.0)
    o_ref[0] = out.reshape(H, W, Cout)


def fold_bn(gamma, beta, mean, var, eps=1e-5):
    scale = gamma / jnp.sqrt(var + eps)
    bias = beta - mean * scale
    return scale.astype(jnp.float32), bias.astype(jnp.float32)


def prepare_params(raw):
    """Fold BN into conv weights, lay weights out for channel-last matmuls."""
    conv1_w, conv2_w, conv3_w = raw["conv1_w"], raw["conv2_w"], raw["conv3_w"]
    width = conv1_w.shape[0]

    s1, b1 = fold_bn(*raw["bn1"])
    s2, b2 = fold_bn(*raw["bn2"])
    s3, b3 = fold_bn(*raw["bn3"])

    # torch (cout, cin, 1, 1) -> (cin, cout), BN scale folded per output col.
    w1 = (conv1_w[:, :, 0, 0].T * s1[None, :]).astype(jnp.bfloat16)
    w3 = (conv3_w[:, :, 0, 0].T * s3[None, :]).astype(jnp.bfloat16)
    # torch (cout, cin, 3, 3) -> (kh, kw, cin, cout), scale, stack (kw,cin)->K.
    w2_t = jnp.transpose(conv2_w, (2, 3, 1, 0)) * s2[None, None, None, :]
    w2 = w2_t.reshape(3, 3 * width, width).astype(jnp.bfloat16)

    return {
        "w1": w1, "b1": b1.reshape(1, -1),
        "w2": w2, "b2": b2.reshape(1, -1),
        "w3": w3, "b3": b3.reshape(1, -1),
    }


def bottleneck_forward(x_nchw, params):
    """Runs the Bottleneck block. Input/output in NCHW (PyTorch convention)."""
    x = jnp.transpose(x_nchw, (0, 2, 3, 1)).astype(jnp.float32)   # -> NHWC
    N, H, W, Cin = x.shape

    w1, b1 = params["w1"], params["b1"]
    w2, b2 = params["w2"], params["b2"]
    w3, b3 = params["w3"], params["b3"]
    width = w1.shape[1]
    Cout = w3.shape[1]
    assert Cout == Cin, "downsample is None => identity add requires Cin == Cout"

    full = lambda a: pl.BlockSpec(a.shape, lambda n: (0,) * a.ndim)

    out_nhwc = pl.pallas_call(
        bottleneck_kernel,
        out_shape=jax.ShapeDtypeStruct((N, H, W, Cout), jnp.float32),
        grid=(N,),
        in_specs=[
            pl.BlockSpec((1, H, W, Cin), lambda n: (n, 0, 0, 0)),
            full(w1), full(b1),
            full(w2), full(b2),
            full(w3), full(b3),
        ],
        out_specs=pl.BlockSpec((1, H, W, Cout), lambda n: (n, 0, 0, 0)),
        scratch_shapes=[pltpu.VMEM((H + 2, W, 3 * width), jnp.bfloat16)],
        compiler_params=pltpu.CompilerParams(
            dimension_semantics=("parallel",)),
    )(x, w1, b1, w2, b2, w3, b3)

    return jnp.transpose(out_nhwc, (0, 3, 1, 2))   # -> NCHW


# ---------------------------------------------------------------------------
# Pure-JAX reference (NCHW, mirrors the PyTorch module's forward exactly).
# ---------------------------------------------------------------------------
def reference_forward(x, raw):
    def conv(x, w, pad):
        return jax.lax.conv_general_dilated(
            x, w, window_strides=(1, 1), padding=[(pad, pad), (pad, pad)],
            dimension_numbers=("NCHW", "OIHW", "NCHW"))

    def bn(x, gamma, beta, mean, var, eps=1e-5):
        g = gamma[None, :, None, None]
        b = beta[None, :, None, None]
        m = mean[None, :, None, None]
        v = var[None, :, None, None]
        return (x - m) / jnp.sqrt(v + eps) * g + b

    identity = x
    out = jnp.maximum(bn(conv(x, raw["conv1_w"], 0), *raw["bn1"]), 0.0)
    out = jnp.maximum(bn(conv(out, raw["conv2_w"], 1), *raw["bn2"]), 0.0)
    out = bn(conv(out, raw["conv3_w"], 0), *raw["bn3"])
    return jnp.maximum(out + identity, 0.0)


if __name__ == "__main__":
    # Small-but-representative shapes: inplanes = planes * expansion so the
    # identity path needs no downsample (downsample=None, stride=1), and the
    # channel (lane) dims are dense like real ResNet-50 stages.
    N, planes, Hs, Ws = 2, 32, 16, 16
    expansion = 4
    inplanes = planes * expansion          # 128
    width = planes                         # base_width=64, groups=1 -> width = planes
    Cout = planes * expansion              # 128

    key = jax.random.PRNGKey(0)
    keys = jax.random.split(key, 16)

    # PyTorch-shaped raw parameters (deterministic, synthetic).
    conv1_w = 0.1 * jax.random.normal(keys[0], (width, inplanes, 1, 1), jnp.float32)
    conv2_w = 0.1 * jax.random.normal(keys[1], (width, width, 3, 3), jnp.float32)
    conv3_w = 0.1 * jax.random.normal(keys[2], (Cout, width, 1, 1), jnp.float32)

    def bn_params(kg, kb, km, kv, c):
        gamma = 0.5 + jax.random.uniform(kg, (c,), jnp.float32)
        beta = 0.1 * jax.random.normal(kb, (c,), jnp.float32)
        mean = 0.1 * jax.random.normal(km, (c,), jnp.float32)
        var = 0.5 + jax.random.uniform(kv, (c,), jnp.float32)
        return gamma, beta, mean, var

    bn1 = bn_params(keys[3], keys[4], keys[5], keys[6], width)
    bn2 = bn_params(keys[7], keys[8], keys[9], keys[10], width)
    bn3 = bn_params(keys[11], keys[12], keys[13], keys[14], Cout)

    raw = {"conv1_w": conv1_w, "conv2_w": conv2_w, "conv3_w": conv3_w,
           "bn1": bn1, "bn2": bn2, "bn3": bn3}
    params = prepare_params(raw)

    x = jax.random.normal(keys[15], (N, inplanes, Hs, Ws), jnp.float32)

    out = jax.block_until_ready(bottleneck_forward(x, params))
    ref = jax.block_until_ready(reference_forward(x, raw))
    assert out.shape == ref.shape == (N, Cout, Hs, Ws)

    out_np, ref_np = np.asarray(out), np.asarray(ref)
    # bf16 MXU operands (f32 accumulation / epilogues) -> loosened tolerance.
    np.testing.assert_allclose(out_np, ref_np, rtol=5e-2, atol=5e-2)
    rel_err = np.linalg.norm(out_np - ref_np) / np.linalg.norm(ref_np)
    assert rel_err < 2e-2, f"relative error too large: {rel_err}"
    print("KERNEL_OK")
</pallas_src>

<mosaic_0001>
module attributes {stable_mosaic.version = 11 : i64} {
  func.func @bottleneck_kernel(%arg0: i32, %arg1: memref<1x16x16x128xf32, #tpu.memory_space<vmem>>, %arg2: memref<128x32xbf16, #tpu.memory_space<vmem>>, %arg3: memref<1x32xf32, #tpu.memory_space<vmem>>, %arg4: memref<3x96x32xbf16, #tpu.memory_space<vmem>>, %arg5: memref<1x32xf32, #tpu.memory_space<vmem>>, %arg6: memref<32x128xbf16, #tpu.memory_space<vmem>>, %arg7: memref<1x128xf32, #tpu.memory_space<vmem>>, %arg8: memref<1x16x16x128xf32, #tpu.memory_space<vmem>>, %arg9: memref<18x16x96xbf16, #tpu.memory_space<vmem>>) attributes {dimension_semantics = [#tpu.dimension_semantics<parallel>], iteration_bounds = array<i64: 2>, scalar_prefetch = 0 : i64, scratch_operands = 1 : i64, tpu.core_type = #tpu.core_type<tc>, window_params = [{transform_indices = @transform_0, window_bounds = array<i64: 1, 16, 16, 128>}, {pipeline_mode = #tpu.pipeline_mode<synchronous>, transform_indices = @transform_1, window_bounds = array<i64: 128, 32>}, {pipeline_mode = #tpu.pipeline_mode<synchronous>, transform_indices = @transform_2, window_bounds = array<i64: 1, 32>}, {pipeline_mode = #tpu.pipeline_mode<synchronous>, transform_indices = @transform_3, window_bounds = array<i64: 3, 96, 32>}, {pipeline_mode = #tpu.pipeline_mode<synchronous>, transform_indices = @transform_4, window_bounds = array<i64: 1, 32>}, {pipeline_mode = #tpu.pipeline_mode<synchronous>, transform_indices = @transform_5, window_bounds = array<i64: 32, 128>}, {pipeline_mode = #tpu.pipeline_mode<synchronous>, transform_indices = @transform_6, window_bounds = array<i64: 1, 128>}, {transform_indices = @transform_7, window_bounds = array<i64: 1, 16, 16, 128>}]} {
    %c0 = arith.constant 0 : index
    %c0_0 = arith.constant 0 : index
    %c0_1 = arith.constant 0 : index
    %c0_2 = arith.constant 0 : index
    %0 = vector.load %arg1[%c0, %c0_0, %c0_1, %c0_2] : memref<1x16x16x128xf32, #tpu.memory_space<vmem>>, vector<1x16x16x128xf32>
    %1 = vector.shape_cast %0 : vector<1x16x16x128xf32> to vector<16x16x128xf32>
    %2 = vector.shape_cast %1 : vector<16x16x128xf32> to vector<256x128xf32>
    %3 = arith.truncf %2 : vector<256x128xf32> to vector<256x128xbf16>
    %c0_3 = arith.constant 0 : index
    %c0_4 = arith.constant 0 : index
    %4 = vector.load %arg2[%c0_3, %c0_4] : memref<128x32xbf16, #tpu.memory_space<vmem>>, vector<128x32xbf16>
    %cst = arith.constant dense<0.000000e+00> : vector<256x32xf32>
    %5 = tpu.matmul %3, %4, %cst {dimension_numbers = #tpu.dot_dimension_numbers<[1], [0], [0], [1], [0, 0, 1, 1], [], []>} : vector<256x128xbf16>, vector<128x32xbf16>, vector<256x32xf32> -> vector<256x32xf32>
    %c0_5 = arith.constant 0 : index
    %c0_6 = arith.constant 0 : index
    %6 = vector.load %arg3[%c0_5, %c0_6] : memref<1x32xf32, #tpu.memory_space<vmem>>, vector<1x32xf32>
    %7 = vector.broadcast %6 : vector<1x32xf32> to vector<256x32xf32>
    %8 = arith.addf %5, %7 : vector<256x32xf32>
    %cst_7 = arith.constant 0.000000e+00 : f32
    %9 = vector.broadcast %cst_7 : f32 to vector<256x32xf32>
    %10 = arith.maximumf %8, %9 : vector<256x32xf32>
    %11 = vector.shape_cast %10 : vector<256x32xf32> to vector<16x16x32xf32>
    %12 = arith.truncf %11 : vector<16x16x32xf32> to vector<16x16x32xbf16>
    %cst_8 = arith.constant 0.000000e+00 : bf16
    %13 = vector.broadcast %cst_8 : bf16 to vector<16x1x32xbf16>
    %14 = vector.extract_strided_slice %12 {offsets = [0, 0, 0], sizes = [16, 15, 32], strides = [1, 1, 1]} : vector<16x16x32xbf16> to vector<16x15x32xbf16>
    %15 = tpu.concatenate %13, %14 in 1 : vector<16x1x32xbf16>, vector<16x15x32xbf16> -> vector<16x16x32xbf16>
    %16 = vector.extract_strided_slice %12 {offsets = [0, 1, 0], sizes = [16, 15, 32], strides = [1, 1, 1]} : vector<16x16x32xbf16> to vector<16x15x32xbf16>
    %17 = tpu.concatenate %16, %13 in 1 : vector<16x15x32xbf16>, vector<16x1x32xbf16> -> vector<16x16x32xbf16>
    %18 = tpu.concatenate %15, %12, %17 in 2 : vector<16x16x32xbf16>, vector<16x16x32xbf16>, vector<16x16x32xbf16> -> vector<16x16x96xbf16>
    %cst_9 = arith.constant 0.000000e+00 : bf16
    %19 = vector.broadcast %cst_9 : bf16 to vector<16x96xbf16>
    %c0_10 = arith.constant 0 : index
    %c0_11 = arith.constant 0 : index
    %c0_12 = arith.constant 0 : index
    %20 = vector.load %arg9[%c0_10, %c0_11, %c0_12] : memref<18x16x96xbf16, #tpu.memory_space<vmem>>, vector<1x16x96xbf16>
    %21 = vector.shape_cast %20 : vector<1x16x96xbf16> to vector<16x96xbf16>
    %22 = vector.shape_cast %19 : vector<16x96xbf16> to vector<1x16x96xbf16>
    tpu.vector_store %arg9[%c0_10, %c0_11, %c0_12], %22 {strides = array<i32>} : memref<18x16x96xbf16, #tpu.memory_space<vmem>>, vector<1x16x96xbf16>,
    %cst_13 = arith.constant 0.000000e+00 : bf16
    %23 = vector.broadcast %cst_13 : bf16 to vector<16x96xbf16>
    %c17 = arith.constant 17 : index
    %c0_14 = arith.constant 0 : index
    %c0_15 = arith.constant 0 : index
    %24 = vector.load %arg9[%c17, %c0_14, %c0_15] : memref<18x16x96xbf16, #tpu.memory_space<vmem>>, vector<1x16x96xbf16>
    %25 = vector.shape_cast %24 : vector<1x16x96xbf16> to vector<16x96xbf16>
    %26 = vector.shape_cast %23 : vector<16x96xbf16> to vector<1x16x96xbf16>
    tpu.vector_store %arg9[%c17, %c0_14, %c0_15], %26 {strides = array<i32>} : memref<18x16x96xbf16, #tpu.memory_space<vmem>>, vector<1x16x96xbf16>,
    %c1 = arith.constant 1 : index
    %c0_16 = arith.constant 0 : index
    %c0_17 = arith.constant 0 : index
    %27 = vector.load %arg9[%c1, %c0_16, %c0_17] : memref<18x16x96xbf16, #tpu.memory_space<vmem>>, vector<16x16x96xbf16>
    tpu.vector_store %arg9[%c1, %c0_16, %c0_17], %18 {strides = array<i32>} : memref<18x16x96xbf16, #tpu.memory_space<vmem>>, vector<16x16x96xbf16>,
    %cst_18 = arith.constant 0.000000e+00 : f32
    %28 = vector.broadcast %cst_18 : f32 to vector<256x32xf32>
    %c0_19 = arith.constant 0 : index
    %c0_20 = arith.constant 0 : index
    %c0_21 = arith.constant 0 : index
    %29 = vector.load %arg9[%c0_19, %c0_20, %c0_21] : memref<18x16x96xbf16, #tpu.memory_space<vmem>>, vector<16x16x96xbf16>
    %30 = vector.shape_cast %29 : vector<16x16x96xbf16> to vector<256x96xbf16>
    %c0_22 = arith.constant 0 : index
    %c0_23 = arith.constant 0 : index
    %c0_24 = arith.constant 0 : index
    %31 = vector.load %arg4[%c0_22, %c0_23, %c0_24] : memref<3x96x32xbf16, #tpu.memory_space<vmem>>, vector<1x96x32xbf16>
    %32 = vector.shape_cast %31 : vector<1x96x32xbf16> to vector<96x32xbf16>
    %cst_25 = arith.constant dense<0.000000e+00> : vector<256x32xf32>
    %33 = tpu.matmul %30, %32, %cst_25 {dimension_numbers = #tpu.dot_dimension_numbers<[1], [0], [0], [1], [0, 0, 1, 1], [], []>} : vector<256x96xbf16>, vector<96x32xbf16>, vector<256x32xf32> -> vector<256x32xf32>
    %34 = arith.addf %28, %33 : vector<256x32xf32>
    %c1_26 = arith.constant 1 : index
    %c0_27 = arith.constant 0 : index
    %c0_28 = arith.constant 0 : index
    %35 = vector.load %arg9[%c1_26, %c0_27, %c0_28] : memref<18x16x96xbf16, #tpu.memory_space<vmem>>, vector<16x16x96xbf16>
    %36 = vector.shape_cast %35 : vector<16x16x96xbf16> to vector<256x96xbf16>
    %c1_29 = arith.constant 1 : index
    %c0_30 = arith.constant 0 : index
    %c0_31 = arith.constant 0 : index
    %37 = vector.load %arg4[%c1_29, %c0_30, %c0_31] : memref<3x96x32xbf16, #tpu.memory_space<vmem>>, vector<1x96x32xbf16>
    %38 = vector.shape_cast %37 : vector<1x96x32xbf16> to vector<96x32xbf16>
    %cst_32 = arith.constant dense<0.000000e+00> : vector<256x32xf32>
    %39 = tpu.matmul %36, %38, %cst_32 {dimension_numbers = #tpu.dot_dimension_numbers<[1], [0], [0], [1], [0, 0, 1, 1], [], []>} : vector<256x96xbf16>, vector<96x32xbf16>, vector<256x32xf32> -> vector<256x32xf32>
    %40 = arith.addf %34, %39 : vector<256x32xf32>
    %c2 = arith.constant 2 : index
    %c0_33 = arith.constant 0 : index
    %c0_34 = arith.constant 0 : index
    %41 = vector.load %arg9[%c2, %c0_33, %c0_34] : memref<18x16x96xbf16, #tpu.memory_space<vmem>>, vector<16x16x96xbf16>
    %42 = vector.shape_cast %41 : vector<16x16x96xbf16> to vector<256x96xbf16>
    %c2_35 = arith.constant 2 : index
    %c0_36 = arith.constant 0 : index
    %c0_37 = arith.constant 0 : index
    %43 = vector.load %arg4[%c2_35, %c0_36, %c0_37] : memref<3x96x32xbf16, #tpu.memory_space<vmem>>, vector<1x96x32xbf16>
    %44 = vector.shape_cast %43 : vector<1x96x32xbf16> to vector<96x32xbf16>
    %cst_38 = arith.constant dense<0.000000e+00> : vector<256x32xf32>
    %45 = tpu.matmul %42, %44, %cst_38 {dimension_numbers = #tpu.dot_dimension_numbers<[1], [0], [0], [1], [0, 0, 1, 1], [], []>} : vector<256x96xbf16>, vector<96x32xbf16>, vector<256x32xf32> -> vector<256x32xf32>
    %46 = arith.addf %40, %45 : vector<256x32xf32>
    %c0_39 = arith.constant 0 : index
    %c0_40 = arith.constant 0 : index
    %47 = vector.load %arg5[%c0_39, %c0_40] : memref<1x32xf32, #tpu.memory_space<vmem>>, vector<1x32xf32>
    %48 = vector.broadcast %47 : vector<1x32xf32> to vector<256x32xf32>
    %49 = arith.addf %46, %48 : vector<256x32xf32>
    %cst_41 = arith.constant 0.000000e+00 : f32
    %50 = vector.broadcast %cst_41 : f32 to vector<256x32xf32>
    %51 = arith.maximumf %49, %50 : vector<256x32xf32>
    %52 = arith.truncf %51 : vector<256x32xf32> to vector<256x32xbf16>
    %c0_42 = arith.constant 0 : index
    %c0_43 = arith.constant 0 : index
    %53 = vector.load %arg6[%c0_42, %c0_43] : memref<32x128xbf16, #tpu.memory_space<vmem>>, vector<32x128xbf16>
    %cst_44 = arith.constant dense<0.000000e+00> : vector<256x128xf32>
    %54 = tpu.matmul %52, %53, %cst_44 {dimension_numbers = #tpu.dot_dimension_numbers<[1], [0], [0], [1], [0, 0, 1, 1], [], []>} : vector<256x32xbf16>, vector<32x128xbf16>, vector<256x128xf32> -> vector<256x128xf32>
    %c0_45 = arith.constant 0 : index
    %c0_46 = arith.constant 0 : index
    %55 = vector.load %arg7[%c0_45, %c0_46] : memref<1x128xf32, #tpu.memory_space<vmem>>, vector<1x128xf32>
    %56 = vector.broadcast %55 : vector<1x128xf32> to vector<256x128xf32>
    %57 = arith.addf %54, %56 : vector<256x128xf32>
    %58 = arith.addf %57, %2 : vector<256x128xf32>
    %cst_47 = arith.constant 0.000000e+00 : f32
    %59 = vector.broadcast %cst_47 : f32 to vector<256x128xf32>
    %60 = arith.maximumf %58, %59 : vector<256x128xf32>
    %61 = vector.shape_cast %60 : vector<256x128xf32> to vector<16x16x128xf32>
    %c0_48 = arith.constant 0 : index
    %c0_49 = arith.constant 0 : index
    %c0_50 = arith.constant 0 : index
    %c0_51 = arith.constant 0 : index
    %62 = vector.load %arg8[%c0_48, %c0_49, %c0_50, %c0_51] : memref<1x16x16x128xf32, #tpu.memory_space<vmem>>, vector<1x16x16x128xf32>
    %63 = vector.shape_cast %62 : vector<1x16x16x128xf32> to vector<16x16x128xf32>
    %64 = vector.shape_cast %61 : vector<16x16x128xf32> to vector<1x16x16x128xf32>
    tpu.vector_store %arg8[%c0_48, %c0_49, %c0_50, %c0_51], %64 {strides = array<i32>} : memref<1x16x16x128xf32, #tpu.memory_space<vmem>>, vector<1x16x16x128xf32>,
    return
  }
  func.func @transform_0(%arg0: i32) -> (i32, i32, i32, i32) {
    %c0_i32 = arith.constant 0 : i32
    %c0_i32_0 = arith.constant 0 : i32
    %c0_i32_1 = arith.constant 0 : i32
    %c0_i32_2 = arith.constant 0 : i32
    return %arg0, %c0_i32, %c0_i32_0, %c0_i32_1 : i32, i32, i32, i32
  }
  func.func @transform_1(%arg0: i32) -> (i32, i32) {
    %c0_i32 = arith.constant 0 : i32
    %c0_i32_0 = arith.constant 0 : i32
    %c0_i32_1 = arith.constant 0 : i32
    return %c0_i32, %c0_i32_0 : i32, i32
  }
  func.func @transform_2(%arg0: i32) -> (i32, i32) {
    %c0_i32 = arith.constant 0 : i32
    %c0_i32_0 = arith.constant 0 : i32
    %c0_i32_1 = arith.constant 0 : i32
    return %c0_i32, %c0_i32_0 : i32, i32
  }
  func.func @transform_3(%arg0: i32) -> (i32, i32, i32) {
    %c0_i32 = arith.constant 0 : i32
    %c0_i32_0 = arith.constant 0 : i32
    %c0_i32_1 = arith.constant 0 : i32
    %c0_i32_2 = arith.constant 0 : i32
    return %c0_i32, %c0_i32_0, %c0_i32_1 : i32, i32, i32
  }
  func.func @transform_4(%arg0: i32) -> (i32, i32) {
    %c0_i32 = arith.constant 0 : i32
    %c0_i32_0 = arith.constant 0 : i32
    %c0_i32_1 = arith.constant 0 : i32
    return %c0_i32, %c0_i32_0 : i32, i32
  }
  func.func @transform_5(%arg0: i32) -> (i32, i32) {
    %c0_i32 = arith.constant 0 : i32
    %c0_i32_0 = arith.constant 0 : i32
    %c0_i32_1 = arith.constant 0 : i32
    return %c0_i32, %c0_i32_0 : i32, i32
  }
  func.func @transform_6(%arg0: i32) -> (i32, i32) {
    %c0_i32 = arith.constant 0 : i32
    %c0_i32_0 = arith.constant 0 : i32
    %c0_i32_1 = arith.constant 0 : i32
    return %c0_i32, %c0_i32_0 : i32, i32
  }
  func.func @transform_7(%arg0: i32) -> (i32, i32, i32, i32) {
    %c0_i32 = arith.constant 0 : i32
    %c0_i32_0 = arith.constant 0 : i32
    %c0_i32_1 = arith.constant 0 : i32
    %c0_i32_2 = arith.constant 0 : i32
    return %arg0, %c0_i32, %c0_i32_0, %c0_i32_1 : i32, i32, i32, i32
  }
}

</mosaic_0001>

<bundles_post_ra>
// kernel: tpu_custom_call.1
= control target key start
LH: loop header
LB: loop body
LE: loop exit
PB: predicated region body
PF: predicated region fallthrough
CT: control target
= control target key end

     0   :  { %12 = vsyncpa [#allocation4], 0  ;;  %s4134_s0 = inlined_call_operand.hbm [shape: f32[2,16,16,128], index: 0, kind: input, shape index: {}]   ;;  %s4135_s1 = inlined_call_operand.vmem [shape: bf16[128,32], index: 1, kind: input, shape index: {}]   ;;  %s4136_s2 = inlined_call_operand.vmem [shape: f32[1,32], index: 2, kind: input, shape index: {}]   ;;  %s4137_s3 = inlined_call_operand.vmem [shape: bf16[3,96,32], index: 3, kind: input, shape index: {}]   ;;  %s4138_s4 = inlined_call_operand.vmem [shape: f32[1,32], index: 4, kind: input, shape index: {}]   ;;  %s4139_s5 = inlined_call_operand.vmem [shape: bf16[32,128], index: 5, kind: input, shape index: {}]   ;;  %s4140_s6 = inlined_call_operand.vmem [shape: f32[1,128], index: 6, kind: input, shape index: {}]   ;;  %s4141_s7 = inlined_call_operand.hbm [shape: f32[2,16,16,128], index: 7, kind: output, shape index: {}]  }
   0x1   :  { %14 = vsyncpa [#allocation4 + $0x1], 0 }
   0x2   :  { %15 = vsyncpa [#allocation5], 0 }
   0x3   :  { %17 = vsyncpa [#allocation5 + $0x1], 0  ;;  %s3264_s24 = smov 0   ;;  %s3266_s25 = smov 0  }
   0x4   :  { %s3268_s26 = smov 0   ;;  %s3270_s27 = smov 0  }
   0x5 LB: > { %s3285_s28 = sadd.s32 4294967295, %s3215_s27   ;;  %s2529_s29 = sadd.s32 4294967294, %s3215_s27   ;;  %s3215_s27 = sphi %s3270_s27, %s4157_s27   ;;  %s3211_s26 = sphi %s3268_s26, %s4156_s26   ;;  %s3207_s25 = sphi %s3266_s25, %s4155_s25   ;;  %s3203_s24 = sphi %s3264_s24, %s4154_s24  }
   0x6   : > { %s3289_s30 = sadd.s32 1, %s3215_s27   ;;  %s30_s8 = sadd.s32 1, %s3211_s26 }
   0x7   : > { %s27_s9 = ssub.s32 %s3215_s27, %s3289_s30  ;;  %p37_p0 = scmp.ne.s32.totalorder %s3211_s26, %s3207_s25 }
   0x8   : > { %p28_p1 = scmp.eq.s32.totalorder %s27_s9, 0  ;;  %p38_p2 = scmp.eq.s32.totalorder %s3215_s27, 0 }
   0x9   : > { %p43_p3 = scmp.ne.s32.totalorder %s3207_s25, %s3203_s24  ;;  %p44_p4 = scmp.eq.s32.totalorder %s3285_s28, 0 }
   0xa   : > { %s3301_s10 = scalar_select %p28_p1, %s3211_s26, %s30_s8  }
   0xb   : > { %p3303_p5 = por %p38_p2, %p37_p0  ;;  %p3307_p6 = por %p44_p4, %p43_p3 }
   0xc   : > { %4142 = sst [smem:[#allocation9_spill]] %s3301_s10  ;;  %p193_p7 = scmp.eq.s32.totalorder %s3285_s28, 1 }
   0xd   : > { %p199_p8 = scmp.eq.s32.totalorder %s2529_s29, 1  ;;  %p3043_p10 = scmp.lt.s32.totalorder %s3215_s27, 2 }
   0xe   : > { %p3314_p11 = por %p193_p7, %p37_p0  ;;  %s237_s15 = sand.u32 1, %s3211_s26  }
   0xf   : > { %p3318_p12 = por %p199_p8, %p43_p3  ;;  %s2935_s16 = sshll.u32 %s3215_s27, 8 }
  0x10   : > { %s2532_s17 = sshll.u32 %s237_s15, 8  ;;  %s246_s20 = scalar_lea.hbm %s4134_s0, %s2935_s16 }
  0x11   : > { %s247_s21 = sshll.u32 %s246_s20, 4  ;;  %s241_s22 = scalar_lea.vmem [#allocation3], %s2532_s17  ;;  %s248_s21 = int_to_ptr.hbm [resolvable:$true] %s247_s21 }
  0x12   : > { %s249_s23 = sshll.u32 %s241_s22, 4  ;;  %p3329_p13 = pnand %p3043_p10, %p3303_p5  ;;  %s250_s23 = int_to_ptr.vmem [resolvable:$true] %s249_s23 }
  0x13   : > { %p2535_p0 = scmp.ge.s32.totalorder %s3215_s27, 1  ;;  %p257_p1 = scmp.lt.s32.totalorder %s3215_s27, 3 }
  0x14   : > { %s238_s8 = scalar_lea.sflag [#allocation4], %s237_s15  ;;  %s3119_s9 = sshra.s32 %s248_s21, 4  ;;  %s3120_s9 = int_to_ptr.hbm [resolvable:$true] %s3119_s9 }
  0x15   : > { %s3121_s10 = scalar_lea.hbm %s3120_s9, 256  ;;  %p3123_p3 = pneg %p3329_p13 }
  0x16   : > { %p3122_p2 = scmp.ne.s32.totalorder %s3120_s9, %s3121_s10  ;;  %s3126_s11 = scalar_lea.hbm %s4134_s0, 512 }
  0x17   : > { %p3127_p5 = scmp.lt.s32.totalorder %s3120_s9, %s4134_s0  ;;  %p3128_p8 = scmp.lt.s32.totalorder %s3126_s11, %s3121_s10 }
  0x18   : > { %p3124_p4 = pnand %p3123_p3, %p3122_p2 }
  0x19   : > { %p3129_p10 = por %p3128_p8, %p3127_p5 }
  0x1a   : > { %p3125_p7 = pneg %p3124_p4 }
  0x1c   : > { %p3130_p9 = pnand %p3129_p10, %p3125_p7 }
  0x1e   : > { %3133 = shalt.err (!%p3130_p9)
}
  0x1f   : > { %s3217_s15 = smov 128   ;;  %s3218_s20 = smov 8  }
  0x20   : > { %3038 = dma.hbm_to_vmem [thread:$0]  (!%p3329_p13), %s248_s21, 4096, %s250_s23, %s238_s8, %s3217_s15, %s3217_s15, %s3218_s20  }
  0x21   : > { %p258_p2 = pnand %p2535_p0, %p257_p1 }
  0x22   : > { %s3350_s22 = sand.u32 (!%p258_p2), 1, %s3207_s25  }
  0x23   : > { %261 = sbr.rel (%p258_p2) target bundleno = 1141 (0x475), region = 48  ;;  %s2536_s10 = sshll.u32 (!%p258_p2), %s3350_s22, 8 }
  0x24   : > { %s264_s9 = scalar_lea.sflag (!%p258_p2), [#allocation4], %s3350_s22  ;;  %s3356_s16 = scalar_lea.vmem (!%p258_p2), [#allocation3], %s2536_s10 }
  0x28   : > { %3194 = dma.done.wait (%p3307_p6), %s264_s9, 4096  }
  0x29   : > { %3196 = vsyncadd (%p3307_p6), %s264_s9, 4294963200  ;;  %v2943_v0 = vld [vmem:[%s4135_s1 + $0x38] sm:$0xff]  ;;  %v2942_v1 = vld [vmem:[%s4135_s1 + $0x30] sm:$0xff]  ;;  %s3219_s19 = smov 32   ;;  %vm844_vm0 = vcmask 1047552   ;;  %s3220_s15 = smov 64  }
  0x2a   : > { %416 = vmatpush.bf16.msra.mxu0 %v2943_v0  ;;  %v2941_v2 = vld [vmem:[%s4135_s1 + $0x28] sm:$0xff]  ;;  %v2940_v3 = vld [vmem:[%s4135_s1 + $0x20] sm:$0xff]  ;;  %v2939_v4 = vld [vmem:[%s4135_s1 + $0x18] sm:$0xff]  ;;  %vm845_vm1 = vsmask.f32 7424  ;;  %vm777_vm3 = vcmask 1040384  }
  0x2b   : > { %v2938_v5 = vld [vmem:[%s4135_s1 + $0x10] sm:$0xff]  ;;  %v2937_v6 = vld [vmem:[%s4135_s1 + $0x8] sm:$0xff]  ;;  %v2936_v7 = vld [vmem:[%s4135_s1] sm:$0xff]  ;;  %vm778_vm4 = vsmask.f32 256  ;;  %vm943_vm5 = vcmask 261120  }
  0x2c   : > { %v300_v8 = vld [vmem:[%s3356_s16] sm:$0xff]  ;;  %v301_v9 = vld [vmem:[%s3356_s16 + $0x8] sm:$0xff]  ;;  %v302_v11 = vld [vmem:[%s3356_s16 + $0x10] sm:$0xff]  ;;  %vm992_vm7 = vcmask 523264   ;;  %vm1025_vm8 = vcmask 781312   ;;  %vm1381_vm9 = vcmask 785408  }
  0x2d   : > { %v332_v10 = vpack.c.bf16 %v301_v9, %v300_v8  ;;  %v303_v12 = vld [vmem:[%s3356_s16 + $0x18] sm:$0xff]  ;;  %v304_v14 = vld [vmem:[%s3356_s16 + $0x20] sm:$0xff]  ;;  %v305_v15 = vld [vmem:[%s3356_s16 + $0x28] sm:$0xff]  ;;  %s3970_s17 = scalar_lea.vmem [#allocation6], %s2536_s10  ;;  %s3012_s10 = sshll.u32 %s3285_s28, 8 }
  0x2e   : > { %417 = vmatpush.bf16.msra.mxu0 %v2942_v1  ;;  %v333_v13 = vpack.c.bf16 %v303_v12, %v302_v11  ;;  %v334_v16 = vpack.c.bf16 %v305_v15, %v304_v14  ;;  %v306_v17 = vld [vmem:[%s3356_s16 + $0x30] sm:$0xff]  ;;  %v307_v18 = vld [vmem:[%s3356_s16 + $0x38] sm:$0xff]  ;;  %v308_v20 = vld [vmem:[%s3356_s16 + $0x40] sm:$0xff]  ;;  %s2452_s18 = scalar_lea.hbm %s4141_s7, %s3012_s10  ;;  %s2453_s20 = sshll.u32 %s3970_s17, 4  ;;  %s2454_s20 = int_to_ptr.vmem [resolvable:$true] %s2453_s20 }
  0x2f   : > { %v335_v19 = vpack.c.bf16 %v307_v18, %v306_v17  ;;  %v309_v21 = vld [vmem:[%s3356_s16 + $0x48] sm:$0xff]  ;;  %v310_v23 = vld [vmem:[%s3356_s16 + $0x50] sm:$0xff]  ;;  %v311_v24 = vld [vmem:[%s3356_s16 + $0x58] sm:$0xff]  ;;  %s2455_s9 = sshll.u32 %s2452_s18, 4  ;;  %s2441_s21 = scalar_lea.sflag [#allocation5], %s3350_s22  ;;  %s2456_s9 = int_to_ptr.hbm [resolvable:$true] %s2455_s9 }
  0x30   : > { %v336_v22 = vpack.c.bf16 %v309_v21, %v308_v20  ;;  %v337_v25 = vpack.c.bf16 %v311_v24, %v310_v23  ;;  %v312_v26 = vld [vmem:[%s3356_s16 + $0x60] sm:$0xff]  ;;  %v313_v27 = vld [vmem:[%s3356_s16 + $0x68] sm:$0xff]  ;;  %v314_v29 = vld [vmem:[%s3356_s16 + $0x70] sm:$0xff]  ;;  %s3163_s28 = sshra.s32 %s2456_s9, 4  ;;  %s3164_s28 = int_to_ptr.hbm [resolvable:$true] %s3163_s28 }
  0x31   : > { %v338_v28 = vpack.c.bf16 %v313_v27, %v312_v26  ;;  %v315_v30 = vld [vmem:[%s3356_s16 + $0x78] sm:$0xff]  ;;  %v316_v32 = vld [vmem:[%s3356_s16 + $0x80] sm:$0xff]  ;;  %v317_v33 = vld [vmem:[%s3356_s16 + $0x88] sm:$0xff]  ;;  %s3165_s23 = scalar_lea.hbm %s3164_s28, 256  ;;  %p3170_p0 = scmp.lt.s32.totalorder %s3164_s28, %s4141_s7 }
  0x32   : > { %418 = vmatpush.bf16.msra.mxu0 %v2941_v2  ;;  %v339_v31 = vpack.c.bf16 %v315_v30, %v314_v29  ;;  %v3407_v34 = vld [vmem:[%s4136_s2] ss:$0 sm:$0xff]  ;;  %v340_v35 = vpack.c.bf16 %v317_v33, %v316_v32  ;;  %v319_v44 = vld [vmem:[%s3356_s16 + $0x98] sm:$0xff]  ;;  %v320_v61 = vld [vmem:[%s3356_s16 + $0xa0] sm:$0xff]  ;;  %p3166_p6 = scmp.ne.s32.totalorder %s3164_s28, %s3165_s23 }
  0x33   : > { %v318_v43 = vld [vmem:[%s3356_s16 + $0x90] sm:$0xff]  ;;  %v321_v62 = vld [vmem:[%s3356_s16 + $0xa8] sm:$0xff]  ;;  %v324_v33 = vld [vmem:[%s3356_s16 + $0xc0] sm:$0xff] }
  0x34   : > { %v341_v48 = vpack.c.bf16 %v319_v44, %v318_v43  ;;  %v342_v2 = vpack.c.bf16 %v321_v62, %v320_v61  ;;  %v322_v15 = vld [vmem:[%s3356_s16 + $0xb0] sm:$0xff]  ;;  %vm3540_vm2 = vmand %vm844_vm0, %vm845_vm1  ;;  %p3167_p9 = pnand %p3166_p6, %p3314_p11 }
  0x35   : > { %vm3650_vm6 = vmand %vm777_vm3, %vm778_vm4 }
  0x36   : > { %419 = vmatpush.bf16.msra.mxu0 %v2940_v3  ;;  %p3168_p13 = pneg %p3167_p9 }
  0x3a   : > { %420 = vmatpush.bf16.msra.mxu0 %v2939_v4 }
  0x3e   : > { %421 = vmatpush.bf16.msra.mxu0 %v2938_v5 }
  0x42   : > { %422 = vmatpush.bf16.msra.mxu0 %v2937_v6 }
  0x46   : > { %423 = vmatpush.bf16.msra.mxu0 %v2936_v7 }
  0x49   : > { %424 = vmatmul.bf16.vlgmr.msra.gmra.mxu0 %v332_v10 }
  0x59   : > { %429 = vmatmul.bf16.gmra.mxu0 %v333_v13 }
  0x69   : > { %434 = vmatmul.bf16.gmra.mxu0 %v334_v16  ;;  %v323_v16 = vld [vmem:[%s3356_s16 + $0xb8] sm:$0xff] }
  0x6a   : > { %v343_v20 = vpack.c.bf16 %v323_v16, %v322_v15  ;;  %v329_v15 = vld [vmem:[%s3356_s16 + $0xe8] sm:$0xff] }
  0x79   : > { %439 = vmatmul.bf16.gmra.mxu0 %v335_v19 }
  0x89   : > { %444 = vmatmul.bf16.gmra.mxu0 %v336_v22 }
  0x99   : > { %449 = vmatmul.bf16.gmra.mxu0 %v337_v25 }
  0xa9   : > { %454 = vmatmul.bf16.gmra.mxu0 %v338_v28 }
  0xb9   : > { %459 = vmatmul.bf16.gmra.mxu0 %v339_v31 }
  0xc6   : > { %v425_v36 = vpop.f32.mrf.mxu0 }
  0xc7   : > { %v426_v37 = vadd.f32 %v3407_v34, %v425_v36 }
  0xc9   : > { %464 = vmatmul.bf16.gmra.mxu0 %v340_v35  ;;  %v505_v38 = vmax.f32 %v426_v37, 0.0  ;;  %v325_v35 = vld [vmem:[%s3356_s16 + $0xc8] sm:$0xff] }
  0xcb   : > { %v537_v41 = vpack.c.bf16 %v505_v38, %v505_v38 }
  0xcd   : > { %v601_v46 = vunpack.c.l.b16 %v537_v41 }
  0xce   : > { %v427_v39 = vpop.f32.mrf.mxu0 }
  0xcf   : > { %v428_v40 = vadd.f32 %v3407_v34, %v427_v39  ;;  %v344_v39 = vpack.c.bf16 %v325_v35, %v324_v33 }
  0xd1   : > { %v506_v42 = vmax.f32 %v428_v40, 0.0 }
  0xd3   : > { %v538_v45 = vpack.c.bf16 %v506_v42, %v506_v42 }
  0xd5   : > { %v602_v47 = vunpack.c.l.b16 %v538_v45 }
  0xd6   : > { %v430_v49 = vpop.f32.mrf.mxu0 }
  0xd7   : > { %v3413_v50 = vpack.c.b16 %v602_v47, %v601_v46  ;;  %v431_v51 = vadd.f32 %v3407_v34, %v430_v49 }
  0xd9   : > { %469 = vmatmul.bf16.gmra.mxu0 %v341_v48  ;;  %v650_v52 = vshrl.u32 %v3413_v50, 16  ;;  %v653_v53 = vshll.u32 %v3413_v50, 16  ;;  %v507_v55 = vmax.f32 %v431_v51, 0.0 }
  0xdb   : > { %v652_v54 = vrot.slane %v650_v52, 7  ;;  %v539_v59 = vpack.c.bf16 %v507_v55, %v507_v55  ;;  %v326_v55 = vld [vmem:[%s3356_s16 + $0xd0] sm:$0xff] }
  0xdd   : > { %v3422_v56 = vor.u32 %v653_v53, %v652_v54  ;;  %v603_v0 = vunpack.c.l.b16 %v539_v59 }
  0xde   : > { %v432_v57 = vpop.f32.mrf.mxu0 }
  0xdf   : > { %v433_v58 = vadd.f32 %v3407_v34, %v432_v57  ;;  %v327_v57 = vld [vmem:[%s3356_s16 + $0xd8] sm:$0xff] }
  0xe0   : > { %v345_v61 = vpack.c.bf16 %v327_v57, %v326_v55 }
  0xe1   : > { %v508_v60 = vmax.f32 %v433_v58, 0.0 }
  0xe3   : > { %v540_v63 = vpack.c.bf16 %v508_v60, %v508_v60 }
  0xe5   : > { %v604_v1 = vunpack.c.l.b16 %v540_v63 }
  0xe6   : > { %v435_v3 = vpop.f32.mrf.mxu0 }
  0xe7   : > { %v3427_v4 = vpack.c.b16 %v604_v1, %v603_v0  ;;  %v436_v5 = vadd.f32 %v3407_v34, %v435_v3 }
  0xe9   : > { %474 = vmatmul.bf16.gmra.mxu0 %v342_v2  ;;  %v657_v6 = vshrl.u32 %v3427_v4, 16  ;;  %v660_v7 = vshll.u32 %v3427_v4, 16  ;;  %v509_v9 = vmax.f32 %v436_v5, 0.0 }
  0xeb   : > { %v659_v8 = vrot.slane %v657_v6, 7  ;;  %v541_v13 = vpack.c.bf16 %v509_v9, %v509_v9 }
  0xed   : > { %v3436_v10 = vor.u32 %v660_v7, %v659_v8  ;;  %v605_v18 = vunpack.c.l.b16 %v541_v13 }
  0xee   : > { %v437_v11 = vpop.f32.mrf.mxu0 }
  0xef   : > { %v438_v12 = vadd.f32 %v3407_v34, %v437_v11 }
  0xf1   : > { %v510_v14 = vmax.f32 %v438_v12, 0.0 }
  0xf3   : > { %v542_v17 = vpack.c.bf16 %v510_v14, %v510_v14  ;;  %v328_v14 = vld [vmem:[%s3356_s16 + $0xe0] sm:$0xff] }
  0xf5   : > { %v606_v19 = vunpack.c.l.b16 %v542_v17 }
  0xf6   : > { %v440_v21 = vpop.f32.mrf.mxu0 }
  0xf7   : > { %v3441_v22 = vpack.c.b16 %v606_v19, %v605_v18  ;;  %v441_v23 = vadd.f32 %v3407_v34, %v440_v21  ;;  %v346_v19 = vpack.c.bf16 %v329_v15, %v328_v14 }
  0xf9   : > { %479 = vmatmul.bf16.gmra.mxu0 %v343_v20  ;;  %v664_v24 = vshrl.u32 %v3441_v22, 16  ;;  %v667_v26 = vshll.u32 %v3441_v22, 16  ;;  %v511_v27 = vmax.f32 %v441_v23, 0.0 }
  0xfb   : > { %v666_v25 = vrot.slane %v664_v24, 7  ;;  %v543_v31 = vpack.c.bf16 %v511_v27, %v511_v27 }
  0xfd   : > { %v3450_v28 = vor.u32 %v667_v26, %v666_v25  ;;  %v607_v37 = vunpack.c.l.b16 %v543_v31 }
  0xfe   : > { %v442_v29 = vpop.f32.mrf.mxu0 }
  0xff   : > { %v443_v30 = vadd.f32 %v3407_v34, %v442_v29 }
 0x101   : > { %v512_v32 = vmax.f32 %v443_v30, 0.0 }
 0x103   : > { %v544_v36 = vpack.c.bf16 %v512_v32, %v512_v32 }
 0x105   : > { %v608_v38 = vunpack.c.l.b16 %v544_v36 }
 0x106   : > { %v445_v40 = vpop.f32.mrf.mxu0 }
 0x107   : > { %v3455_v41 = vpack.c.b16 %v608_v38, %v607_v37  ;;  %v446_v42 = vadd.f32 %v3407_v34, %v445_v40  ;;  %v330_v37 = vld [vmem:[%s3356_s16 + $0xf0] sm:$0xff]  ;;  %v331_v38 = vld [vmem:[%s3356_s16 + $0xf8] sm:$0xff] }
 0x109   : > { %484 = vmatmul.bf16.gmra.mxu0 %v344_v39  ;;  %v671_v43 = vshrl.u32 %v3455_v41, 16  ;;  %v674_v45 = vshll.u32 %v3455_v41, 16  ;;  %v513_v46 = vmax.f32 %v446_v42, 0.0 }
 0x10b   : > { %v673_v44 = vrot.slane %v671_v43, 7  ;;  %v545_v51 = vpack.c.bf16 %v513_v46, %v513_v46 }
 0x10d   : > { %v3464_v47 = vor.u32 %v674_v45, %v673_v44  ;;  %v609_v59 = vunpack.c.l.b16 %v545_v51  ;;  %v347_v44 = vpack.c.bf16 %v331_v38, %v330_v37 }
 0x10e   : > { %v447_v48 = vpop.f32.mrf.mxu0 }
 0x10f   : > { %v448_v49 = vadd.f32 %v3407_v34, %v447_v48 }
 0x111   : > { %v514_v54 = vmax.f32 %v448_v49, 0.0 }
 0x113   : > { %v546_v58 = vpack.c.bf16 %v514_v54, %v514_v54 }
 0x115   : > { %v610_v60 = vunpack.c.l.b16 %v546_v58 }
 0x116   : > { %v450_v62 = vpop.f32.mrf.mxu0 }
 0x117   : > { %v3469_v63 = vpack.c.b16 %v610_v60, %v609_v59  ;;  %v451_v0 = vadd.f32 %v3407_v34, %v450_v62 }
 0x119   : > { %489 = vmatmul.bf16.gmra.mxu0 %v345_v61  ;;  %v678_v1 = vshrl.u32 %v3469_v63, 16  ;;  %v681_v3 = vshll.u32 %v3469_v63, 16  ;;  %v515_v5 = vmax.f32 %v451_v0, 0.0 }
 0x11b   : > { %v680_v2 = vrot.slane %v678_v1, 7  ;;  %v547_v12 = vpack.c.bf16 %v515_v5, %v515_v5 }
 0x11d   : > { %v3478_v8 = vor.u32 %v681_v3, %v680_v2  ;;  %v611_v17 = vunpack.c.l.b16 %v547_v12 }
 0x11e   : > { %v452_v9 = vpop.f32.mrf.mxu0 }
 0x11f   : > { %v453_v11 = vadd.f32 %v3407_v34, %v452_v9 }
 0x121   : > { %v516_v13 = vmax.f32 %v453_v11, 0.0 }
 0x123   : > { %v548_v16 = vpack.c.bf16 %v516_v13, %v516_v13 }
 0x125   : > { %v612_v18 = vunpack.c.l.b16 %v548_v16 }
 0x126   : > { %v455_v20 = vpop.f32.mrf.mxu0 }
 0x127   : > { %v3483_v21 = vpack.c.b16 %v612_v18, %v611_v17  ;;  %v456_v23 = vadd.f32 %v3407_v34, %v455_v20  ;;  %v2987_v17 = vld [vmem:[%s4137_s3 + $0x58] sm:$0xff] }
 0x128   : > { %1432 = vmatpush.bf16.msrb.mxu0 %v2987_v17  ;;  %3014 = vmatpush.bf16.msra.mxu2 %v2987_v17 }
 0x129   : > { %494 = vmatmul.bf16.gmra.mxu0 %v346_v19  ;;  %v685_v25 = vshrl.u32 %v3483_v21, 16  ;;  %v688_v29 = vshll.u32 %v3483_v21, 16  ;;  %v517_v30 = vmax.f32 %v456_v23, 0.0  ;;  %3015 = vmatpush.bf16.msra.mxu3 %v2987_v17 }
 0x12a   : > { %3013 = vmatpush.bf16.msra.mxu1 %v2987_v17 }
 0x12b   : > { %v687_v27 = vrot.slane %v685_v25, 7  ;;  %v549_v35 = vpack.c.bf16 %v517_v30, %v517_v30 }
 0x12d   : > { %v3492_v31 = vor.u32 %v688_v29, %v687_v27  ;;  %v613_v40 = vunpack.c.l.b16 %v549_v35 }
 0x12e   : > { %v457_v32 = vpop.f32.mrf.mxu0 }
 0x12f   : > { %v458_v33 = vadd.f32 %v3407_v34, %v457_v32 }
 0x131   : > { %v518_v36 = vmax.f32 %v458_v33, 0.0 }
 0x133   : > { %v550_v39 = vpack.c.bf16 %v518_v36, %v518_v36 }
 0x135   : > { %v614_v42 = vunpack.c.l.b16 %v550_v39 }
 0x136   : > { %v460_v46 = vpop.f32.mrf.mxu0 }
 0x137   : > { %v3497_v48 = vpack.c.b16 %v614_v42, %v613_v40  ;;  %v461_v49 = vadd.f32 %v3407_v34, %v460_v46 }
 0x139   : > { %499 = vmatmul.bf16.gmra.mxu0 %v347_v44  ;;  %v692_v51 = vshrl.u32 %v3497_v48, 16  ;;  %v695_v55 = vshll.u32 %v3497_v48, 16  ;;  %v519_v57 = vmax.f32 %v461_v49, 0.0 }
 0x13b   : > { %v694_v54 = vrot.slane %v692_v51, 7  ;;  %v551_v61 = vpack.c.bf16 %v519_v57, %v519_v57 }
 0x13d   : > { %v3506_v58 = vor.u32 %v695_v55, %v694_v54  ;;  %v615_v2 = vunpack.c.l.b16 %v551_v61 }
 0x13e   : > { %v462_v59 = vpop.f32.mrf.mxu0 }
 0x13f   : > { %v463_v60 = vadd.f32 %v3407_v34, %v462_v59 }
 0x141   : > { %v520_v62 = vmax.f32 %v463_v60, 0.0 }
 0x143   : > { %v552_v0 = vpack.c.bf16 %v520_v62, %v520_v62 }
 0x145   : > { %v616_v5 = vunpack.c.l.b16 %v552_v0 }
 0x146   : > { %v465_v9 = vpop.f32.mrf.mxu0 }
 0x147   : > { %v3509_v11 = vpack.c.b16 %v616_v5, %v615_v2  ;;  %v466_v12 = vadd.f32 %v3407_v34, %v465_v9 }
 0x149   : > { %v699_v13 = vshrl.u32 %v3509_v11, 16  ;;  %v702_v15 = vshll.u32 %v3509_v11, 16  ;;  %v521_v16 = vmax.f32 %v466_v12, 0.0 }
 0x14b   : > { %v701_v14 = vrot.slane %v699_v13, 7  ;;  %v553_v23 = vpack.c.bf16 %v521_v16, %v521_v16 }
 0x14d   : > { %v3521_v18 = vor.u32 %v702_v15, %v701_v14  ;;  %v617_v32 = vunpack.c.l.b16 %v553_v23 }
 0x14e   : > { %v467_v19 = vpop.f32.mrf.mxu0 }
 0x14f   : > { %v468_v20 = vadd.f32 %v3407_v34, %v467_v19 }
 0x151   : > { %v522_v27 = vmax.f32 %v468_v20, 0.0 }
 0x153   : > { %v554_v30 = vpack.c.bf16 %v522_v27, %v522_v27 }
 0x155   : > { %v618_v33 = vunpack.c.l.b16 %v554_v30 }
 0x156   : > { %v470_v35 = vpop.f32.mrf.mxu0 }
 0x157   : > { %v3524_v36 = vpack.c.b16 %v618_v33, %v617_v32  ;;  %v471_v37 = vadd.f32 %v3407_v34, %v470_v35 }
 0x159   : > { %v706_v38 = vshrl.u32 %v3524_v36, 16  ;;  %v709_v40 = vshll.u32 %v3524_v36, 16  ;;  %v523_v42 = vmax.f32 %v471_v37, 0.0 }
 0x15b   : > { %v708_v39 = vrot.slane %v706_v38, 7  ;;  %v555_v54 = vpack.c.bf16 %v523_v42, %v523_v42  ;;  %v2986_v42 = vld [vmem:[%s4137_s3 + $0x50] sm:$0xff] }
 0x15c   : > { %1433 = vmatpush.bf16.msrb.mxu0 %v2986_v42  ;;  %3017 = vmatpush.bf16.msra.mxu2 %v2986_v42 }
 0x15d   : > { %v3533_v44 = vor.u32 %v709_v40, %v708_v39  ;;  %v619_v60 = vunpack.c.l.b16 %v555_v54  ;;  %3018 = vmatpush.bf16.msra.mxu3 %v2986_v42  ;;  %3016 = vmatpush.bf16.msra.mxu1 %v2986_v42 }
 0x15e   : > { %v472_v46 = vpop.f32.mrf.mxu0 }
 0x15f   : > { %v473_v49 = vadd.f32 %v3407_v34, %v472_v46 }
 0x161   : > { %v524_v57 = vmax.f32 %v473_v49, 0.0 }
 0x163   : > { %v556_v59 = vpack.c.bf16 %v524_v57, %v524_v57 }
 0x165   : > { %v620_v61 = vunpack.c.l.b16 %v556_v59 }
 0x166   : > { %v475_v62 = vpop.f32.mrf.mxu0 }
 0x167   : > { %v642_v0 = vpack.c.b16 %v620_v61, %v619_v60  ;;  %v476_v2 = vadd.f32 %v3407_v34, %v475_v62 }
 0x169   : > { %881 = vrot.lane.b32.xlu0 %v642_v0, %s3219_s19  ;;  %v713_v5 = vshrl.u32 %v642_v0, 16  ;;  %v716_v9 = vshll.u32 %v642_v0, 16  ;;  %v525_v16 = vmax.f32 %v476_v2, 0.0 }
 0x16b   : > { %v814_v12 = vrot.slane %v716_v9, 1  ;;  %v715_v14 = vrot.slane %v713_v5, 7  ;;  %v557_v32 = vpack.c.bf16 %v525_v16, %v525_v16 }
 0x16d   : > { %v815_v17 = vor.u32 %v814_v12, %v713_v5  ;;  %v3538_v19 = vor.u32 %v716_v9, %v715_v14  ;;  %v621_v37 = vunpack.c.l.b16 %v557_v32 }
 0x16e   : > { %v477_v20 = vpop.f32.mrf.mxu0 }
 0x16f   : > { %v478_v27 = vadd.f32 %v3407_v34, %v477_v20  ;;  %v856_v30 = vsel %vm3540_vm2, %v815_v17, 0 }
 0x171   : > { %v526_v33 = vmax.f32 %v478_v27, 0.0  ;;  %929 = vrot.lane.b32.xlu0 %v856_v30, %s3220_s15 }
 0x173   : > { %v558_v35 = vpack.c.bf16 %v526_v33, %v526_v33 }
 0x175   : > { %v622_v39 = vunpack.c.l.b16 %v558_v35 }
 0x176   : > { %v480_v46 = vpop.f32.mrf.mxu0 }
 0x177   : > { %v643_v49 = vpack.c.b16 %v622_v39, %v621_v37  ;;  %v481_v54 = vadd.f32 %v3407_v34, %v480_v46 }
 0x179   : > { %883 = vrot.lane.b32.xlu1 %v643_v49, %s3219_s19  ;;  %v720_v57 = vshrl.u32 %v643_v49, 16  ;;  %v723_v59 = vshll.u32 %v643_v49, 16  ;;  %v527_v62 = vmax.f32 %v481_v54, 0.0 }
 0x17b   : > { %v816_v60 = vrot.slane %v723_v59, 1  ;;  %v722_v61 = vrot.slane %v720_v57, 7  ;;  %v559_v14 = vpack.c.bf16 %v527_v62, %v527_v62 }
 0x17d   : > { %v817_v0 = vor.u32 %v816_v60, %v720_v57  ;;  %v3553_v2 = vor.u32 %v723_v59, %v722_v61  ;;  %v623_v20 = vunpack.c.l.b16 %v559_v14 }
 0x17e   : > { %v482_v5 = vpop.f32.mrf.mxu0 }
 0x17f   : > { %v483_v9 = vadd.f32 %v3407_v34, %v482_v5  ;;  %v857_v12 = vsel %vm3540_vm2, %v817_v0, 0 }
 0x181   : > { %v528_v16 = vmax.f32 %v483_v9, 0.0  ;;  %931 = vrot.lane.b32.xlu1 %v857_v12, %s3220_s15 }
 0x183   : > { %v560_v17 = vpack.c.bf16 %v528_v16, %v528_v16 }
 0x185   : > { %v624_v27 = vunpack.c.l.b16 %v560_v17 }
 0x186   : > { %v485_v30 = vpop.f32.mrf.mxu0 }
 0x187   : > { %v644_v32 = vpack.c.b16 %v624_v27, %v623_v20  ;;  %v486_v33 = vadd.f32 %v3407_v34, %v485_v30 }
 0x189   : > { %885 = vrot.lane.b32.xlu2 %v644_v32, %s3219_s19  ;;  %v727_v35 = vshrl.u32 %v644_v32, 16  ;;  %v730_v37 = vshll.u32 %v644_v32, 16  ;;  %v529_v46 = vmax.f32 %v486_v33, 0.0 }
 0x18b   : > { %v818_v39 = vrot.slane %v730_v37, 1  ;;  %v729_v42 = vrot.slane %v727_v35, 7  ;;  %v561_v61 = vpack.c.bf16 %v529_v46, %v529_v46 }
 0x18d   : > { %v819_v49 = vor.u32 %v818_v39, %v727_v35  ;;  %v3561_v54 = vor.u32 %v730_v37, %v729_v42  ;;  %v625_v5 = vunpack.c.l.b16 %v561_v61  ;;  %v2985_v35 = vld [vmem:[%s4137_s3 + $0x48] sm:$0xff] }
 0x18e   : > { %v487_v57 = vpop.f32.mrf.mxu0  ;;  %1434 = vmatpush.bf16.msrb.mxu0 %v2985_v35  ;;  %3020 = vmatpush.bf16.msra.mxu2 %v2985_v35 }
 0x18f   : > { %v488_v59 = vadd.f32 %v3407_v34, %v487_v57  ;;  %v858_v60 = vsel %vm3540_vm2, %v819_v49, 0  ;;  %3021 = vmatpush.bf16.msra.mxu3 %v2985_v35  ;;  %3019 = vmatpush.bf16.msra.mxu1 %v2985_v35 }
 0x191   : > { %v530_v62 = vmax.f32 %v488_v59, 0.0  ;;  %933 = vrot.lane.b32.xlu2 %v858_v60, %s3220_s15 }
 0x193   : > { %v562_v0 = vpack.c.bf16 %v530_v62, %v530_v62 }
 0x195   : > { %v626_v9 = vunpack.c.l.b16 %v562_v0 }
 0x196   : > { %v490_v12 = vpop.f32.mrf.mxu0 }
 0x197   : > { %v645_v14 = vpack.c.b16 %v626_v9, %v625_v5  ;;  %v491_v16 = vadd.f32 %v3407_v34, %v490_v12 }
 0x199   : > { %887 = vrot.lane.b32.xlu0 %v645_v14, %s3219_s19  ;;  %v734_v17 = vshrl.u32 %v645_v14, 16  ;;  %v737_v20 = vshll.u32 %v645_v14, 16  ;;  %v531_v32 = vmax.f32 %v491_v16, 0.0 }
 0x19b   : > { %v736_v27 = vrot.slane %v734_v17, 7  ;;  %v820_v30 = vrot.slane %v737_v20, 1  ;;  %v563_v49 = vpack.c.bf16 %v531_v32, %v531_v32 }
 0x19d   : > { %v821_v33 = vor.u32 %v820_v30, %v734_v17  ;;  %v3572_v37 = vor.u32 %v737_v20, %v736_v27  ;;  %v627_v60 = vunpack.c.l.b16 %v563_v49 }
 0x19e   : > { %v492_v39 = vpop.f32.mrf.mxu0 }
 0x19f   : > { %v493_v42 = vadd.f32 %v3407_v34, %v492_v39  ;;  %v859_v46 = vsel %vm3540_vm2, %v821_v33, 0 }
 0x1a0   : > { %935 = vrot.lane.b32.xlu1 %v859_v46, %s3220_s15 }
 0x1a1   : > { %v532_v57 = vmax.f32 %v493_v42, 0.0 }
 0x1a3   : > { %v564_v59 = vpack.c.bf16 %v532_v57, %v532_v57 }
 0x1a5   : > { %v628_v61 = vunpack.c.l.b16 %v564_v59 }
 0x1a6   : > { %v495_v62 = vpop.f32.mrf.mxu0 }
 0x1a7   : > { %v646_v0 = vpack.c.b16 %v628_v61, %v627_v60  ;;  %v496_v5 = vadd.f32 %v3407_v34, %v495_v62 }
 0x1a9   : > { %889 = vrot.lane.b32.xlu1 %v646_v0, %s3219_s19  ;;  %v741_v9 = vshrl.u32 %v646_v0, 16  ;;  %v744_v14 = vshll.u32 %v646_v0, 16  ;;  %v533_v16 = vmax.f32 %v496_v5, 0.0 }
 0x1ab   : > { %v743_v12 = vrot.slane %v741_v9, 7  ;;  %v565_v30 = vpack.c.bf16 %v533_v16, %v533_v16  ;;  %v822_v49 = vrot.slane %v744_v14, 1 }
 0x1ad   : > { %v3580_v17 = vor.u32 %v744_v14, %v743_v12  ;;  %v629_v35 = vunpack.c.l.b16 %v565_v30  ;;  %v823_v0 = vor.u32 %v822_v49, %v741_v9  ;;  %v796_v49 = vrot.slane %v653_v53, 1 }
 0x1ae   : > { %v497_v20 = vpop.f32.mrf.mxu0 }
 0x1af   : > { %v498_v27 = vadd.f32 %v3407_v34, %v497_v20  ;;  %v860_v14 = vsel %vm3540_vm2, %v823_v0, 0 }
 0x1b1   : > { %v534_v32 = vmax.f32 %v498_v27, 0.0 }
 0x1b3   : > { %v566_v33 = vpack.c.bf16 %v534_v32, %v534_v32 }
 0x1b5   : > { %v630_v39 = vunpack.c.l.b16 %v566_v33 }
 0x1b6   : > { %v500_v42 = vpop.f32.mrf.mxu0 }
 0x1b7   : > { %v647_v46 = vpack.c.b16 %v630_v39, %v629_v35  ;;  %v501_v57 = vadd.f32 %v3407_v34, %v500_v42  ;;  %v2984_v42 = vld [vmem:[%s4137_s3 + $0x40] sm:$0xff] }
 0x1b8   : > { %1435 = vmatpush.bf16.msrb.mxu0 %v2984_v42  ;;  %3023 = vmatpush.bf16.msra.mxu2 %v2984_v42 }
 0x1b9   : > { %891 = vrot.lane.b32.xlu2 %v647_v46, %s3219_s19  ;;  %v748_v59 = vshrl.u32 %v647_v46, 16  ;;  %v751_v60 = vshll.u32 %v647_v46, 16  ;;  %v535_v5 = vmax.f32 %v501_v57, 0.0  ;;  %v798_v46 = vrot.slane %v660_v7, 1  ;;  %3024 = vmatpush.bf16.msra.mxu3 %v2984_v42 }
 0x1ba   : > { %3022 = vmatpush.bf16.msra.mxu1 %v2984_v42 }
 0x1bb   : > { %v750_v61 = vrot.slane %v748_v59, 7  ;;  %v824_v62 = vrot.slane %v751_v60, 1  ;;  %v567_v32 = vpack.c.bf16 %v535_v5, %v535_v5  ;;  %v799_v53 = vor.u32 %v798_v46, %v657_v6 }
 0x1bc   : > { %v800_v6 = vrot.slane %v667_v26, 1  ;;  %v806_v46 = vrot.slane %v688_v29, 1  ;;  %v791_v29 = vsel %vm3650_vm6, 0, %v3561_v54  ;;  %v2965_v54 = vld [vmem:[%s4137_s3 + $0x28] sm:$0xff] }
 0x1bd   : > { %v825_v12 = vor.u32 %v824_v62, %v748_v59  ;;  %v3585_v20 = vor.u32 %v751_v60, %v750_v61  ;;  %v631_v35 = vunpack.c.l.b16 %v567_v32  ;;  %v2983_v60 = vld [vmem:[%s4137_s3 + $0x38] sm:$0xff]  ;;  %v797_v62 = vor.u32 %v796_v49, %v650_v52 }
 0x1be   : > { %v502_v16 = vpop.f32.mrf.mxu0  ;;  %3026 = vmatpush.bf16.msra.mxu2 %v2983_v60  ;;  %1436 = vmatpush.bf16.msrb.mxu0 %v2983_v60  ;;  %v801_v32 = vor.u32 %v800_v6, %v664_v24  ;;  %v810_v49 = vrot.slane %v702_v15, 1  ;;  %v807_v15 = vor.u32 %v806_v46, %v685_v25 }
 0x1bf   : > { %v503_v27 = vadd.f32 %v3407_v34, %v502_v16  ;;  %v861_v30 = vsel %vm3540_vm2, %v825_v12, 0  ;;  %v2982_v12 = vld [vmem:[%s4137_s3 + $0x30] sm:$0xff]  ;;  %3027 = vmatpush.bf16.msra.mxu3 %v2983_v60  ;;  %3025 = vmatpush.bf16.msra.mxu1 %v2983_v60  ;;  %v847_v52 = vsel %vm3540_vm2, %v797_v62, 0 }
 0x1c0   : > { %939 = vrot.lane.b32.xlu0 %v861_v30, %s3220_s15  ;;  %v804_v30 = vrot.slane %v681_v3, 1 }
 0x1c1   : > { %v536_v33 = vmax.f32 %v503_v27, 0.0  ;;  %937 = vrot.lane.b32.xlu2 %v860_v14, %s3220_s15  ;;  %v802_v27 = vrot.slane %v674_v45, 1  ;;  %v849_v45 = vsel %vm3540_vm2, %v801_v32, 0 }
 0x1c2   : > { %3029 = vmatpush.bf16.msra.mxu2 %v2982_v12  ;;  %1437 = vmatpush.bf16.msrb.mxu0 %v2982_v12 }
 0x1c3   : > { %v568_v9 = vpack.c.bf16 %v536_v33, %v536_v33  ;;  %3030 = vmatpush.bf16.msra.mxu3 %v2982_v12  ;;  %3028 = vmatpush.bf16.msra.mxu1 %v2982_v12  ;;  %v803_v26 = vor.u32 %v802_v27, %v671_v43 }
 0x1c5   : > { %v632_v39 = vunpack.c.l.b16 %v568_v9  ;;  %v850_v3 = vsel %vm3540_vm2, %v803_v26, 0 }
 0x1c6   : > { %1685 = vmatpush.bf16.msrb.mxu2 %v2965_v54 }
 0x1c7   : > { %v648_v34 = vpack.c.b16 %v632_v39, %v631_v35 }
 0x1c9   : > { %893 = vrot.lane.b32.xlu0 %v648_v34, %s3219_s19  ;;  %865 = vrot.lane.b32.xlu2 %v3427_v4, %s3219_s19  ;;  %v755_v57 = vshrl.u32 %v648_v34, 16  ;;  %v758_v59 = vshll.u32 %v648_v34, 16  ;;  %v848_v4 = vsel %vm3540_vm2, %v799_v53, 0 }
 0x1cb   : > { %v757_v61 = vrot.slane %v755_v57, 7  ;;  %v826_v7 = vrot.slane %v758_v59, 1 }
 0x1cd   : > { %v827_v0 = vor.u32 %v826_v7, %v755_v57  ;;  %v3611_v5 = vor.u32 %v758_v59, %v757_v61  ;;  %v811_v61 = vor.u32 %v810_v49, %v699_v13  ;;  %v790_v13 = vsel %vm3650_vm6, 0, %v3553_v2 }
 0x1cf   : > { %v862_v16 = vsel %vm3540_vm2, %v827_v0, 0 }
 0x1d0   : > { %941 = vrot.lane.b32.xlu1 %v862_v16, %s3220_s15 }
 0x1d1   : > { %913 = vrot.lane.b32.xlu0 %v848_v4, %s3220_s15  ;;  %911 = vrot.lane.b32.xlu2 %v847_v52, %s3220_s15 }
 0x1d8   : > { %863 = vrot.lane.b32.xlu1 %v3413_v50, %s3219_s19  ;;  %v805_v50 = vor.u32 %v804_v30, %v678_v1 }
 0x1d9   : > { %867 = vrot.lane.b32.xlu0 %v3441_v22, %s3219_s19  ;;  %869 = vrot.lane.b32.xlu2 %v3455_v41, %s3219_s19  ;;  %v789_v41 = vsel %vm3650_vm6, 0, %v3538_v19  ;;  %v808_v19 = vrot.slane %v695_v55, 1 }
 0x1da   : > { %v851_v22 = vsel %vm3540_vm2, %v805_v50, 0 }
 0x1db   : > { %v882_v14 = vpop.permute.xlu0 %881  ;;  %v809_v60 = vor.u32 %v808_v19, %v692_v51 }
 0x1dc   : > { %v973_v43 = vsel %vm943_vm5, %v789_v41, %v882_v14  ;;  %v812_v14 = vrot.slane %v709_v40, 1  ;;  %v2963_v40 = vld [vmem:[%s4137_s3 + $0x18] sm:$0xff] }
 0x1dd   : > { %v853_v25 = vsel %vm3540_vm2, %v809_v60, 0  ;;  %v794_v60 = vsel %vm3650_vm6, 0, %v3585_v20 }
 0x1de   : > { %v813_v2 = vor.u32 %v812_v14, %v706_v38  ;;  %v792_v38 = vsel %vm3650_vm6, 0, %v3572_v37  ;;  %v2962_v37 = vld [vmem:[%s4137_s3 + $0x10] sm:$0xff] }
 0x1e0   : > { %915 = vrot.lane.b32.xlu1 %v849_v45, %s3220_s15  ;;  %v855_v32 = vsel %vm3540_vm2, %v813_v2, 0 }
 0x1e1   : > { %917 = vrot.lane.b32.xlu0 %v850_v3, %s3220_s15  ;;  %919 = vrot.lane.b32.xlu2 %v851_v22, %s3220_s15 }
 0x1e3   : > { %v886_v1 = vpop.permute.xlu2 %885  ;;  %v930_v33 = vpop.permute.xlu0 %929 }
 0x1e4   : > { %v1012_v9 = vsel %vm992_vm7, %v973_v43, %v930_v33 }
 0x1e5   : > { %v1065_v35 = vunpack.c.l.b16 %v1012_v9  ;;  %v1066_v39 = vunpack.c.h.b16 %v1012_v9 }
 0x1e7   : > { %v1097_v42 = vpack.c.b16 %v1065_v35, %v1065_v35  ;;  %v1098_v34 = vpack.c.b16 %v1066_v39, %v1066_v39  ;;  %v793_v35 = vsel %vm3650_vm6, 0, %v3580_v17  ;;  %v2961_v17 = vld [vmem:[%s4137_s3 + $0x8] sm:$0xff] }
 0x1e8   : > { %871 = vrot.lane.b32.xlu1 %v3469_v63, %s3219_s19  ;;  %v979_v63 = vsel %vm943_vm5, %v791_v29, %v886_v1 }
 0x1e9   : > { %1162 = vst.msk [vmem:[#allocation2 + $0x50] sm:$0xf] %vm1025_vm8, %v1097_v42  ;;  %873 = vrot.lane.b32.xlu0 %v3483_v21, %s3219_s19  ;;  %875 = vrot.lane.b32.xlu2 %v3497_v48, %s3219_s19  ;;  %v852_v21 = vsel %vm3540_vm2, %v807_v15, 0  ;;  %v854_v48 = vsel %vm3540_vm2, %v811_v61, 0  ;;  %v2960_v15 = vld [vmem:[%s4137_s3] sm:$0xff] }
 0x1ea   : > { %1163 = vst.msk [vmem:[#allocation2 + $0x54] sm:$0xf] %vm1025_vm8, %v1098_v34  ;;  %v3009_v34 = vld [vmem:[%s4137_s3 + $0x88] sm:$0xff] }
 0x1eb   : > { %v934_v55 = vpop.permute.xlu2 %933  ;;  %v884_v57 = vpop.permute.xlu1 %883  ;;  %1984 = vmatpush.bf16.msrb.mxu3 %v3009_v34 }
 0x1ec   : > { %v1016_v59 = vsel %vm992_vm7, %v979_v63, %v934_v55  ;;  %v976_v12 = vsel %vm943_vm5, %v790_v13, %v884_v57  ;;  %v3221_v57 = vmov 0   ;;  %v3005_v13 = vld [vmem:[%s4137_s3 + $0x68] sm:$0xff] }
 0x1ed   : > { %v1069_v7 = vunpack.c.l.b16 %v1016_v59  ;;  %v1070_v53 = vunpack.c.h.b16 %v1016_v59  ;;  %1026 = vst.msk [vmem:[#allocation2] sm:$0xf] %vm1025_vm8, %v3221_v57  ;;  %v3008_v59 = vld [vmem:[%s4137_s3 + $0x80] sm:$0xff] }
 0x1ee   : > { %1027 = vst.msk [vmem:[#allocation2 + $0x4] sm:$0xf] %vm1025_vm8, %v3221_v57 }
 0x1ef   : > { %v1101_v62 = vpack.c.b16 %v1069_v7, %v1069_v7  ;;  %v1102_v0 = vpack.c.b16 %v1070_v53, %v1070_v53  ;;  %1029 = vst.msk [vmem:[#allocation2 + $0x88] sm:$0xf] %vm1025_vm8, %v3221_v57  ;;  %1985 = vmatpush.bf16.msrb.mxu3 %v3008_v59  ;;  %v3007_v53 = vld [vmem:[%s4137_s3 + $0x78] sm:$0xff] }
 0x1f0   : > { %921 = vrot.lane.b32.xlu1 %v852_v21, %s3220_s15  ;;  %1030 = vst.msk [vmem:[#allocation2 + $0x8c] sm:$0xf] %vm1025_vm8, %v3221_v57 }
 0x1f1   : > { %1166 = vst.msk [vmem:[#allocation2 + $0x60] sm:$0xf] %vm1025_vm8, %v1101_v62  ;;  %923 = vrot.lane.b32.xlu0 %v853_v25, %s3220_s15  ;;  %925 = vrot.lane.b32.xlu2 %v854_v48, %s3220_s15  ;;  %v2975_v51 = vld [vmem:[#allocation2 + $0x50] sm:$0xff] }
 0x1f2   : > { %1167 = vst.msk [vmem:[#allocation2 + $0x64] sm:$0xf] %vm1025_vm8, %v1102_v0  ;;  %2679 = vmatmul.msk.bf16.vlgmr.msra.gmra.mxu2 %vm1381_vm9, %v2975_v51  ;;  %v3006_v25 = vld [vmem:[%s4137_s3 + $0x70] sm:$0xff] }
 0x1f3   : > { %v932_v16 = vpop.permute.xlu1 %931  ;;  %1986 = vmatpush.bf16.msrb.mxu3 %v3007_v53 }
 0x1f4   : > { %v1014_v4 = vsel %vm992_vm7, %v976_v12, %v932_v16  ;;  %v3004_v16 = vld [vmem:[%s4137_s3 + $0x60] sm:$0xff] }
 0x1f5   : > { %v1067_v52 = vunpack.c.l.b16 %v1014_v4  ;;  %v1068_v6 = vunpack.c.h.b16 %v1014_v4  ;;  %v2944_v4 = vld [vmem:[#allocation2] sm:$0xff] }
 0x1f7   : > { %v1099_v27 = vpack.c.b16 %v1067_v52, %v1067_v52  ;;  %v1100_v30 = vpack.c.b16 %v1068_v6, %v1068_v6  ;;  %1987 = vmatpush.bf16.msrb.mxu3 %v3006_v25  ;;  %v795_v6 = vsel %vm3650_vm6, 0, %v3611_v5 }
 0x1f8   : > { %877 = vrot.lane.b32.xlu1 %v3509_v11, %s3219_s19  ;;  %v2964_v11 = vld [vmem:[%s4137_s3 + $0x20] sm:$0xff] }
 0x1f9   : > { %1164 = vst.msk [vmem:[#allocation2 + $0x58] sm:$0xf] %vm1025_vm8, %v1099_v27  ;;  %879 = vrot.lane.b32.xlu0 %v3524_v36, %s3219_s19  ;;  %1686 = vmatpush.bf16.msrb.mxu2 %v2964_v11  ;;  %v2977_v23 = vld [vmem:[#allocation2 + $0x60] sm:$0xff]  ;;  %v781_v27 = vsel %vm3650_vm6, 0, %v3436_v10 }
 0x1fa   : > { %1165 = vst.msk [vmem:[#allocation2 + $0x5c] sm:$0xf] %vm1025_vm8, %v1100_v30 }
 0x1fb   : > { %1988 = vmatpush.bf16.msrb.mxu3 %v3005_v13 }
 0x1fd   : > { %1687 = vmatpush.bf16.msrb.mxu2 %v2963_v40 }
 0x1ff   : > { %1989 = vmatpush.bf16.msrb.mxu3 %v3004_v16 }
 0x200   : > { %927 = vrot.lane.b32.xlu1 %v855_v32, %s3220_s15  ;;  %s3169_s15 = scalar_lea.hbm %s4141_s7, 512 }
 0x201   : > { %v2976_v26 = vld [vmem:[#allocation2 + $0x58] sm:$0xff]  ;;  %1688 = vmatpush.bf16.msrb.mxu2 %v2962_v37  ;;  %p3171_p1 = scmp.lt.s32.totalorder %s3169_s15, %s3165_s23 }
 0x202   : > { %2680 = vmatmul.msk.bf16.gmra.mxu2 %vm1381_vm9, %v2976_v26 }
 0x203   : > { %p3172_p3 = por %p3171_p1, %p3170_p0 }
 0x205   : > { %1689 = vmatpush.bf16.msrb.mxu2 %v2961_v17  ;;  %p3173_p4 = pnand %p3172_p3, %p3168_p13 }
 0x209   : > { %1690 = vmatpush.bf16.msrb.mxu2 %v2960_v15 }
 0x20b   : > { %v888_v36 = vpop.permute.xlu0 %887 }
 0x20c   : > { %v982_v50 = vsel %vm943_vm5, %v792_v38, %v888_v36 }
 0x212   : > { %v936_v45 = vpop.permute.xlu1 %935  ;;  %2681 = vmatmul.msk.bf16.gmra.mxu2 %vm1381_vm9, %v2977_v23 }
 0x213   : > { %v1018_v3 = vsel %vm992_vm7, %v982_v50, %v936_v45  ;;  %v892_v22 = vpop.permute.xlu2 %891 }
 0x214   : > { %v1071_v41 = vunpack.c.l.b16 %v1018_v3  ;;  %v1072_v43 = vunpack.c.h.b16 %v1018_v3  ;;  %v988_v54 = vsel %vm943_vm5, %v794_v60, %v892_v22 }
 0x216   : > { %v1103_v1 = vpack.c.b16 %v1071_v41, %v1071_v41  ;;  %v1104_v33 = vpack.c.b16 %v1072_v43, %v1072_v43  ;;  %v780_v41 = vsel %vm3650_vm6, 0, %v3422_v56  ;;  %v783_v56 = vsel %vm3650_vm6, 0, %v3464_v47 }
 0x218   : > { %1168 = vst.msk [vmem:[#allocation2 + $0x68] sm:$0xf] %vm1025_vm8, %v1103_v1 }
 0x219   : > { %1169 = vst.msk [vmem:[#allocation2 + $0x6c] sm:$0xf] %vm1025_vm8, %v1104_v33 }
 0x21b   : > { %v938_v9 = vpop.permute.xlu2 %937  ;;  %v890_v39 = vpop.permute.xlu1 %889 }
 0x21c   : > { %v985_v42 = vsel %vm943_vm5, %v793_v35, %v890_v39 }
 0x21d   : > { %v1020_v46 = vsel %vm992_vm7, %v985_v42, %v938_v9 }
 0x21e   : > { %v1073_v19 = vunpack.c.l.b16 %v1020_v46  ;;  %v1074_v49 = vunpack.c.h.b16 %v1020_v46  ;;  %v782_v46 = vsel %vm3650_vm6, 0, %v3450_v28 }
 0x220   : > { %v1105_v29 = vpack.c.b16 %v1073_v19, %v1073_v19  ;;  %v1106_v63 = vpack.c.b16 %v1074_v49, %v1074_v49  ;;  %v2978_v55 = vld [vmem:[#allocation2 + $0x68] sm:$0xff] }
 0x222   : > { %1170 = vst.msk [vmem:[#allocation2 + $0x70] sm:$0xf] %vm1025_vm8, %v1105_v29  ;;  %2682 = vmatmul.msk.bf16.gmra.mxu2 %vm1381_vm9, %v2978_v55 }
 0x223   : > { %1171 = vst.msk [vmem:[#allocation2 + $0x74] sm:$0xf] %vm1025_vm8, %v1106_v63  ;;  %v866_v51 = vpop.permute.xlu2 %865 }
 0x224   : > { %v949_v32 = vsel %vm943_vm5, %v781_v27, %v866_v51 }
 0x22a   : > { %v2979_v61 = vld [vmem:[#allocation2 + $0x70] sm:$0xff] }
 0x22b   : > { %v912_v30 = vpop.permute.xlu2 %911 }
 0x232   : > { %v940_v7 = vpop.permute.xlu0 %939  ;;  %2683 = vmatmul.msk.bf16.gmra.mxu2 %vm1381_vm9, %v2979_v61 }
 0x233   : > { %v1022_v62 = vsel %vm992_vm7, %v988_v54, %v940_v7  ;;  %v870_v33 = vpop.permute.xlu2 %869 }
 0x234   : > { %v1075_v0 = vunpack.c.l.b16 %v1022_v62  ;;  %v1076_v21 = vunpack.c.h.b16 %v1022_v62  ;;  %v955_v29 = vsel %vm943_vm5, %v783_v56, %v870_v33 }
 0x236   : > { %v1107_v20 = vpack.c.b16 %v1075_v0, %v1075_v0  ;;  %v1108_v48 = vpack.c.b16 %v1076_v21, %v1076_v21  ;;  %v784_v0 = vsel %vm3650_vm6, 0, %v3478_v8  ;;  %v785_v8 = vsel %vm3650_vm6, 0, %v3492_v31 }
 0x238   : > { %1172 = vst.msk [vmem:[#allocation2 + $0x78] sm:$0xf] %vm1025_vm8, %v1107_v20 }
 0x239   : > { %1173 = vst.msk [vmem:[#allocation2 + $0x7c] sm:$0xf] %vm1025_vm8, %v1108_v48 }
 0x23b   : > { %v894_v12 = vpop.permute.xlu0 %893  ;;  %v920_v60 = vpop.permute.xlu2 %919 }
 0x23c   : > { %v991_v14 = vsel %vm943_vm5, %v795_v6, %v894_v12  ;;  %v786_v6 = vsel %vm3650_vm6, 0, %v3506_v58 }
 0x240   : > { %v2980_v52 = vld [vmem:[#allocation2 + $0x78] sm:$0xff] }
 0x241   : > { %2684 = vmatmul.msk.bf16.vlgmr.msra.gmra.mxu3 %vm1381_vm9, %v2980_v52 }
 0x242   : > { %v942_v2 = vpop.permute.xlu1 %941  ;;  %2774 = vmatmul.msk.bf16.vlgmr.msrb.gmra.mxu2 %vm1381_vm9, %v2944_v4 }
 0x243   : > { %v1024_v26 = vsel %vm992_vm7, %v991_v14, %v942_v2  ;;  %v914_v11 = vpop.permute.xlu0 %913  ;;  %v876_v4 = vpop.permute.xlu2 %875 }
 0x244   : > { %v1077_v40 = vunpack.c.l.b16 %v1024_v26  ;;  %v1078_v36 = vunpack.c.h.b16 %v1024_v26  ;;  %v996_v5 = vsel %vm992_vm7, %v949_v32, %v914_v11  ;;  %v964_v14 = vsel %vm943_vm5, %v786_v6, %v876_v4 }
 0x245   : > { %v1049_v38 = vunpack.c.l.b16 %v996_v5  ;;  %v1050_v23 = vunpack.c.h.b16 %v996_v5 }
 0x246   : > { %v1109_v10 = vpack.c.b16 %v1077_v40, %v1077_v40  ;;  %v1110_v50 = vpack.c.b16 %v1078_v36, %v1078_v36 }
 0x247   : > { %v1081_v45 = vpack.c.b16 %v1049_v38, %v1049_v38  ;;  %v1082_v3 = vpack.c.b16 %v1050_v23, %v1050_v23 }
 0x248   : > { %1174 = vst.msk [vmem:[#allocation2 + $0x80] sm:$0xf] %vm1025_vm8, %v1109_v10 }
 0x249   : > { %1175 = vst.msk [vmem:[#allocation2 + $0x84] sm:$0xf] %vm1025_vm8, %v1110_v50 }
 0x24a   : > { %1146 = vst.msk [vmem:[#allocation2 + $0x10] sm:$0xf] %vm1025_vm8, %v1081_v45  ;;  %v864_v22 = vpop.permute.xlu1 %863  ;;  %v787_v45 = vsel %vm3650_vm6, 0, %v3521_v18 }
 0x24b   : > { %1147 = vst.msk [vmem:[#allocation2 + $0x14] sm:$0xf] %vm1025_vm8, %v1082_v3  ;;  %v946_v43 = vsel %vm943_vm5, %v780_v41, %v864_v22  ;;  %v868_v1 = vpop.permute.xlu0 %867  ;;  %v926_v41 = vpop.permute.xlu2 %925 }
 0x24c   : > { %v994_v37 = vsel %vm992_vm7, %v946_v43, %v912_v30  ;;  %v952_v19 = vsel %vm943_vm5, %v782_v46, %v868_v1 }
 0x24d   : > { %v1047_v9 = vunpack.c.l.b16 %v994_v37  ;;  %v1048_v35 = vunpack.c.h.b16 %v994_v37 }
 0x24f   : > { %v1079_v39 = vpack.c.b16 %v1047_v9, %v1047_v9  ;;  %v1080_v42 = vpack.c.b16 %v1048_v35, %v1048_v35 }
 0x250   : > { %v2981_v34 = vld [vmem:[#allocation2 + $0x80] sm:$0xff] }
 0x251   : > { %1144 = vst.msk [vmem:[#allocation2 + $0x8] sm:$0xf] %vm1025_vm8, %v1079_v39  ;;  %2685 = vmatmul.msk.bf16.gmra.mxu3 %vm1381_vm9, %v2981_v34 }
 0x252   : > { %1145 = vst.msk [vmem:[#allocation2 + $0xc] sm:$0xf] %vm1025_vm8, %v1080_v42  ;;  %v916_v49 = vpop.permute.xlu1 %915  ;;  %v2988_v52 = vld [vmem:[#allocation2 + $0x10] sm:$0xff]  ;;  %v788_v42 = vsel %vm3650_vm6, 0, %v3533_v44 }
 0x253   : > { %v998_v63 = vsel %vm992_vm7, %v952_v19, %v916_v49  ;;  %v918_v55 = vpop.permute.xlu0 %917  ;;  %v2967_v10 = vld [vmem:[#allocation2 + $0x10] sm:$0xff] }
 0x254   : > { %v1051_v17 = vunpack.c.l.b16 %v998_v63  ;;  %v1052_v57 = vunpack.c.h.b16 %v998_v63  ;;  %v1000_v28 = vsel %vm992_vm7, %v955_v29, %v918_v55  ;;  %v2946_v22 = vld [vmem:[#allocation2 + $0x10] sm:$0xff] }
 0x255   : > { %v1053_v15 = vunpack.c.l.b16 %v1000_v28  ;;  %v1054_v59 = vunpack.c.h.b16 %v1000_v28 }
 0x256   : > { %v1083_v47 = vpack.c.b16 %v1051_v17, %v1051_v17  ;;  %v1084_v61 = vpack.c.b16 %v1052_v57, %v1052_v57 }
 0x257   : > { %v1085_v54 = vpack.c.b16 %v1053_v15, %v1053_v15  ;;  %v1086_v7 = vpack.c.b16 %v1054_v59, %v1054_v59  ;;  %v3011_v59 = vld [vmem:[%s4139_s5 + $0x8] sm:$0xff] }
 0x258   : > { %1148 = vst.msk [vmem:[#allocation2 + $0x18] sm:$0xf] %vm1025_vm8, %v1083_v47  ;;  %2261 = vmatpush.bf16.msrb.mxu1 %v3011_v59 }
 0x259   : > { %1149 = vst.msk [vmem:[#allocation2 + $0x1c] sm:$0xf] %vm1025_vm8, %v1084_v61  ;;  %v2966_v53 = vld [vmem:[#allocation2 + $0x8] sm:$0xff] }
 0x25a   : > { %v2945_v62 = vld [vmem:[#allocation2 + $0x8] sm:$0xff]  ;;  %1150 = vst.msk [vmem:[#allocation2 + $0x20] sm:$0xf] %vm1025_vm8, %v1085_v54  ;;  %v872_v21 = vpop.permute.xlu1 %871  ;;  %2670 = vmatmul.msk.bf16.vlgmr.msrb.gmra.mxu0 %vm1381_vm9, %v2966_v53 }
 0x25b   : > { %1151 = vst.msk [vmem:[#allocation2 + $0x24] sm:$0xf] %vm1025_vm8, %v1086_v7  ;;  %v958_v25 = vsel %vm943_vm5, %v784_v0, %v872_v21  ;;  %v874_v20 = vpop.permute.xlu0 %873  ;;  %2775 = vmatmul.msk.bf16.gmra.mxu2 %vm1381_vm9, %v2945_v62 }
 0x25c   : > { %v1002_v48 = vsel %vm992_vm7, %v958_v25, %v920_v60  ;;  %v961_v27 = vsel %vm943_vm5, %v785_v8, %v874_v20 }
 0x25d   : > { %v1055_v51 = vunpack.c.l.b16 %v1002_v48  ;;  %v1056_v13 = vunpack.c.h.b16 %v1002_v48 }
 0x25f   : > { %v1087_v12 = vpack.c.b16 %v1055_v51, %v1055_v51  ;;  %v1088_v16 = vpack.c.b16 %v1056_v13, %v1056_v13  ;;  %v3010_v13 = vld [vmem:[%s4139_s5] sm:$0xff] }
 0x260   : > { %v2989_v39 = vld [vmem:[#allocation2 + $0x18] sm:$0xff]  ;;  %2262 = vmatpush.bf16.msrb.mxu1 %v3010_v13 }
 0x261   : > { %1152 = vst.msk [vmem:[#allocation2 + $0x28] sm:$0xf] %vm1025_vm8, %v1087_v12  ;;  %2890 = vmatmul.msk.bf16.vlgmr.msrb.gmra.mxu3 %vm1381_vm9, %v2988_v52  ;;  %v2968_v44 = vld [vmem:[#allocation2 + $0x18] sm:$0xff] }
 0x262   : > { %1153 = vst.msk [vmem:[#allocation2 + $0x2c] sm:$0xf] %vm1025_vm8, %v1088_v16  ;;  %v922_v30 = vpop.permute.xlu1 %921  ;;  %v2947_v17 = vld [vmem:[#allocation2 + $0x18] sm:$0xff]  ;;  %v2990_v28 = vld [vmem:[#allocation2 + $0x20] sm:$0xff] }
 0x263   : > { %v1004_v2 = vsel %vm992_vm7, %v961_v27, %v922_v30  ;;  %v924_v32 = vpop.permute.xlu0 %923  ;;  %v2969_v60 = vld [vmem:[#allocation2 + $0x20] sm:$0xff] }
 0x264   : > { %v1057_v26 = vunpack.c.l.b16 %v1004_v2  ;;  %v1058_v11 = vunpack.c.h.b16 %v1004_v2  ;;  %v1006_v31 = vsel %vm992_vm7, %v964_v14, %v924_v32  ;;  %v2948_v61 = vld [vmem:[#allocation2 + $0x20] sm:$0xff] }
 0x265   : > { %v1059_v40 = vunpack.c.l.b16 %v1006_v31  ;;  %v1060_v36 = vunpack.c.h.b16 %v1006_v31 }
 0x266   : > { %v1089_v5 = vpack.c.b16 %v1057_v26, %v1057_v26  ;;  %v1090_v58 = vpack.c.b16 %v1058_v11, %v1058_v11 }
 0x267   : > { %v1091_v38 = vpack.c.b16 %v1059_v40, %v1059_v40  ;;  %v1092_v23 = vpack.c.b16 %v1060_v36, %v1060_v36 }
 0x268   : > { %1154 = vst.msk [vmem:[#allocation2 + $0x30] sm:$0xf] %vm1025_vm8, %v1089_v5 }
 0x269   : > { %1155 = vst.msk [vmem:[#allocation2 + $0x34] sm:$0xf] %vm1025_vm8, %v1090_v58  ;;  %v2970_v50 = vld [vmem:[#allocation2 + $0x28] sm:$0xff] }
 0x26a   : > { %1156 = vst.msk [vmem:[#allocation2 + $0x38] sm:$0xf] %vm1025_vm8, %v1091_v38  ;;  %v878_v3 = vpop.permute.xlu1 %877  ;;  %2671 = vmatmul.msk.bf16.gmra.mxu0 %vm1381_vm9, %v2967_v10  ;;  %2674 = vmatmul.msk.bf16.vlgmr.msra.gmra.mxu1 %vm1381_vm9, %v2970_v50  ;;  %v2991_v7 = vld [vmem:[#allocation2 + $0x28] sm:$0xff]  ;;  %v2996_v38 = vld [vmem:[#allocation2 + $0x50] sm:$0xff] }
 0x26b   : > { %1157 = vst.msk [vmem:[#allocation2 + $0x3c] sm:$0xf] %vm1025_vm8, %v1092_v23  ;;  %v967_v43 = vsel %vm943_vm5, %v787_v45, %v878_v3  ;;  %2776 = vmatmul.msk.bf16.gmra.mxu2 %vm1381_vm9, %v2946_v22  ;;  %v880_v18 = vpop.permute.xlu0 %879  ;;  %v2949_v0 = vld [vmem:[#allocation2 + $0x28] sm:$0xff]  ;;  %v3918_v22 = vld [vmem:[%s4138_s4] ss:$0 sm:$0xff] }
 0x26c   : > { %v1008_v1 = vsel %vm992_vm7, %v967_v43, %v926_v41  ;;  %v970_v34 = vsel %vm943_vm5, %v788_v42, %v880_v18  ;;  %v2954_v41 = vld [vmem:[#allocation2 + $0x50] sm:$0xff]  ;;  %v2997_v18 = vld [vmem:[#allocation2 + $0x58] sm:$0xff] }
 0x26d   : > { %v1061_v33 = vunpack.c.l.b16 %v1008_v1  ;;  %v1062_v37 = vunpack.c.h.b16 %v1008_v1 }
 0x26f   : > { %v1093_v9 = vpack.c.b16 %v1061_v33, %v1061_v33  ;;  %v1094_v35 = vpack.c.b16 %v1062_v37, %v1062_v37 }
 0x270   : > { %v2971_v24 = vld [vmem:[#allocation2 + $0x30] sm:$0xff] }
 0x271   : > { %1158 = vst.msk [vmem:[#allocation2 + $0x40] sm:$0xf] %vm1025_vm8, %v1093_v9  ;;  %2891 = vmatmul.msk.bf16.gmra.mxu3 %vm1381_vm9, %v2989_v39  ;;  %v2992_v25 = vld [vmem:[#allocation2 + $0x30] sm:$0xff] }
 0x272   : > { %1159 = vst.msk [vmem:[#allocation2 + $0x44] sm:$0xf] %vm1025_vm8, %v1094_v35  ;;  %v928_v46 = vpop.permute.xlu1 %927  ;;  %v2972_v47 = vld [vmem:[#allocation2 + $0x38] sm:$0xff]  ;;  %v2950_v51 = vld [vmem:[#allocation2 + $0x30] sm:$0xff] }
 0x273   : > { %v1010_v56 = vsel %vm992_vm7, %v970_v34, %v928_v46  ;;  %v2993_v16 = vld [vmem:[#allocation2 + $0x38] sm:$0xff] }
 0x274   : > { %v1063_v19 = vunpack.c.l.b16 %v1010_v56  ;;  %v1064_v49 = vunpack.c.h.b16 %v1010_v56  ;;  %v2951_v52 = vld [vmem:[#allocation2 + $0x38] sm:$0xff] }
 0x275   : > { %v3859_v55 = vpop.f32.mrf.mxu2 }
 0x276   : > { %v1095_v29 = vpack.c.b16 %v1063_v19, %v1063_v19  ;;  %v1096_v63 = vpack.c.b16 %v1064_v49, %v1064_v49 }
 0x278   : > { %1160 = vst.msk [vmem:[#allocation2 + $0x48] sm:$0xf] %vm1025_vm8, %v1095_v29 }
 0x279   : > { %1161 = vst.msk [vmem:[#allocation2 + $0x4c] sm:$0xf] %vm1025_vm8, %v1096_v63  ;;  %v2973_v62 = vld [vmem:[#allocation2 + $0x40] sm:$0xff]  ;;  %v2955_v63 = vld [vmem:[#allocation2 + $0x58] sm:$0xff] }
 0x27a   : > { %2672 = vmatmul.msk.bf16.gmra.mxu0 %vm1381_vm9, %v2968_v44  ;;  %2675 = vmatmul.msk.bf16.gmra.mxu1 %vm1381_vm9, %v2971_v24  ;;  %v2994_v8 = vld [vmem:[#allocation2 + $0x40] sm:$0xff] }
 0x27b   : > { %2777 = vmatmul.msk.bf16.gmra.mxu2 %vm1381_vm9, %v2947_v17  ;;  %v2952_v30 = vld [vmem:[#allocation2 + $0x40] sm:$0xff] }
 0x27d   : > { %v3866_v57 = vpop.f32.mrf.mxu2 }
 0x280   : > { %v2974_v48 = vld [vmem:[#allocation2 + $0x48] sm:$0xff] }
 0x281   : > { %2892 = vmatmul.msk.bf16.gmra.mxu3 %vm1381_vm9, %v2990_v28  ;;  %v2995_v32 = vld [vmem:[#allocation2 + $0x48] sm:$0xff] }
 0x282   : > { %v2953_v40 = vld [vmem:[#allocation2 + $0x48] sm:$0xff] }
 0x285   : > { %v3869_v15 = vpop.f32.mrf.mxu2 }
 0x28a   : > { %2673 = vmatmul.msk.bf16.gmra.mxu0 %vm1381_vm9, %v2969_v60  ;;  %2676 = vmatmul.msk.bf16.gmra.mxu1 %vm1381_vm9, %v2972_v47 }
 0x28b   : > { %2778 = vmatmul.msk.bf16.gmra.mxu2 %vm1381_vm9, %v2948_v61  ;;  %v2998_v61 = vld [vmem:[#allocation2 + $0x60] sm:$0xff] }
 0x28d   : > { %v3877_v54 = vpop.f32.mrf.mxu2 }
 0x291   : > { %2893 = vmatmul.msk.bf16.gmra.mxu3 %vm1381_vm9, %v2991_v7 }
 0x295   : > { %v3880_v53 = vpop.f32.mrf.mxu2 }
 0x29a   : > { %2677 = vmatmul.msk.bf16.gmra.mxu1 %vm1381_vm9, %v2973_v62 }
 0x29b   : > { %2779 = vmatmul.msk.bf16.gmra.mxu2 %vm1381_vm9, %v2949_v0 }
 0x29d   : > { %v3884_v21 = vpop.f32.mrf.mxu2 }
 0x2a1   : > { %2894 = vmatmul.msk.bf16.gmra.mxu3 %vm1381_vm9, %v2992_v25 }
 0x2a5   : > { %v3887_v20 = vpop.f32.mrf.mxu2 }
 0x2aa   : > { %2678 = vmatmul.msk.bf16.gmra.mxu1 %vm1381_vm9, %v2974_v48 }
 0x2ab   : > { %2780 = vmatmul.msk.bf16.gmra.mxu2 %vm1381_vm9, %v2950_v51 }
 0x2ad   : > { %v3894_v12 = vpop.f32.mrf.mxu2 }
 0x2b1   : > { %2895 = vmatmul.msk.bf16.gmra.mxu3 %vm1381_vm9, %v2993_v16 }
 0x2b5   : > { %v3897_v4 = vpop.f32.mrf.mxu2 }
 0x2bb   : > { %2781 = vmatmul.msk.bf16.gmra.mxu2 %vm1381_vm9, %v2951_v52  ;;  %v2956_v52 = vld [vmem:[#allocation2 + $0x60] sm:$0xff] }
 0x2bd   : > { %v3900_v6 = vpop.f32.mrf.mxu2 }
 0x2c1   : > { %2896 = vmatmul.msk.bf16.gmra.mxu3 %vm1381_vm9, %v2994_v8 }
 0x2c4   : > { %v3903_v27 = vpop.f32.mrf.mxu3 }
 0x2c5   : > { %v1692_v14 = vpop.f32.mrf.mxu2 }
 0x2cb   : > { %2782 = vmatmul.msk.bf16.gmra.mxu2 %vm1381_vm9, %v2952_v30 }
 0x2cc   : > { %v3906_v2 = vpop.f32.mrf.mxu3 }
 0x2cd   : > { %v1694_v26 = vpop.f32.mrf.mxu2 }
 0x2d1   : > { %2897 = vmatmul.msk.bf16.gmra.mxu3 %vm1381_vm9, %v2995_v32 }
 0x2d4   : > { %v3909_v11 = vpop.f32.mrf.mxu3 }
 0x2d7   : > { %v1439_v31 = vpop.f32.mrf.mxu0 }
 0x2d8   : > { %v1693_v50 = vadd.f32 %v1692_v14, %v1439_v31 }
 0x2db   : > { %2783 = vmatmul.msk.bf16.gmra.mxu2 %vm1381_vm9, %v2953_v40 }
 0x2dc   : > { %v3912_v36 = vpop.f32.mrf.mxu3 }
 0x2de   : > { %v1697_v5 = vpop.f32.mrf.mxu2 }
 0x2df   : > { %v1441_v58 = vpop.f32.mrf.mxu0 }
 0x2e0   : > { %v1695_v43 = vadd.f32 %v1694_v26, %v1441_v58 }
 0x2e1   : > { %2898 = vmatmul.msk.bf16.gmra.mxu3 %vm1381_vm9, %v2996_v38 }
 0x2e4   : > { %v1991_v23 = vpop.f32.mrf.mxu3 }
 0x2e5   : > { %v2071_v3 = vadd.f32 %v1991_v23, %v1693_v50 }
 0x2e6   : > { %v1699_v10 = vpop.f32.mrf.mxu2 }
 0x2e7   : > { %v1444_v45 = vpop.f32.mrf.mxu0  ;;  %v2107_v33 = vadd.f32 %v3918_v22, %v2071_v3  ;;  %v1459_v58 = vpop.f32.mrf.mxu1 }
 0x2e8   : > { %v1698_v49 = vadd.f32 %v1697_v5, %v1444_v45  ;;  %v2999_v5 = vld [vmem:[#allocation2 + $0x68] sm:$0xff] }
 0x2e9   : > { %v2139_v42 = vmax.f32 %v2107_v33, 0.0 }
 0x2eb   : > { %2784 = vmatmul.msk.bf16.gmra.mxu2 %vm1381_vm9, %v2954_v41 }
 0x2ec   : > { %v1993_v1 = vpop.f32.mrf.mxu3 }
 0x2ed   : > { %v2072_v37 = vadd.f32 %v1993_v1, %v1695_v43  ;;  %v2957_v1 = vld [vmem:[#allocation2 + $0x68] sm:$0xff] }
 0x2ee   : > { %v1702_v9 = vpop.f32.mrf.mxu2 }
 0x2ef   : > { %v2108_v35 = vadd.f32 %v3918_v22, %v2072_v37  ;;  %v1446_v39 = vpop.f32.mrf.mxu0  ;;  %v1461_v33 = vpop.f32.mrf.mxu1 }
 0x2f0   : > { %v1700_v24 = vadd.f32 %v1699_v10, %v1446_v39 }
 0x2f1   : > { %v2140_v34 = vmax.f32 %v2108_v35, 0.0  ;;  %2899 = vmatmul.msk.bf16.gmra.mxu3 %vm1381_vm9, %v2997_v18 }
 0x2f3   : > { %v2171_v46 = vpack.c.bf16 %v2140_v34, %v2139_v42  ;;  %v3000_v34 = vld [vmem:[#allocation2 + $0x70] sm:$0xff] }
 0x2f4   : > { %v1996_v56 = vpop.f32.mrf.mxu3 }
 0x2f5   : > { %2914 = vmatmul.msk.bf16.vlgmr.msrb.gmra.mxu1 %vm943_vm5, %v2171_v46  ;;  %v2073_v29 = vadd.f32 %v1996_v56, %v1698_v49 }
 0x2f6   : > { %v1704_v19 = vpop.f32.mrf.mxu2 }
 0x2f7   : > { %v1449_v44 = vpop.f32.mrf.mxu0  ;;  %v2109_v28 = vadd.f32 %v3918_v22, %v2073_v29  ;;  %v1464_v49 = vpop.f32.mrf.mxu1 }
 0x2f8   : > { %v1703_v13 = vadd.f32 %v1702_v9, %v1449_v44 }
 0x2f9   : > { %v2141_v7 = vmax.f32 %v2109_v28, 0.0 }
 0x2fb   : > { %2785 = vmatmul.msk.bf16.gmra.mxu2 %vm1381_vm9, %v2955_v63 }
 0x2fc   : > { %v1998_v17 = vpop.f32.mrf.mxu3 }
 0x2fd   : > { %v2074_v59 = vadd.f32 %v1998_v17, %v1700_v24  ;;  %v2958_v17 = vld [vmem:[#allocation2 + $0x70] sm:$0xff] }
 0x2fe   : > { %v1707_v60 = vpop.f32.mrf.mxu2 }
 0x2ff   : > { %v2110_v47 = vadd.f32 %v3918_v22, %v2074_v59  ;;  %v1451_v25 = vpop.f32.mrf.mxu0 }
 0x300   : > { %v1705_v8 = vadd.f32 %v1704_v19, %v1451_v25 }
 0x301   : > { %v2142_v62 = vmax.f32 %v2110_v47, 0.0  ;;  %2900 = vmatmul.msk.bf16.gmra.mxu3 %vm1381_vm9, %v2998_v61  ;;  %v1466_v61 = vpop.f32.mrf.mxu1 }
 0x303   : > { %v2172_v0 = vpack.c.bf16 %v2142_v62, %v2141_v7 }
 0x304   : > { %v2001_v48 = vpop.f32.mrf.mxu3 }
 0x305   : > { %2915 = vmatmul.msk.bf16.gmra.mxu1 %vm943_vm5, %v2172_v0  ;;  %v2075_v16 = vadd.f32 %v2001_v48, %v1703_v13  ;;  %v3001_v0 = vld [vmem:[#allocation2 + $0x78] sm:$0xff] }
 0x306   : > { %v1709_v51 = vpop.f32.mrf.mxu2 }
 0x307   : > { %v2111_v14 = vadd.f32 %v3918_v22, %v2075_v16  ;;  %v1454_v26 = vpop.f32.mrf.mxu0 }
 0x308   : > { %v1708_v3 = vadd.f32 %v1707_v60, %v1454_v26 }
 0x309   : > { %v2143_v38 = vmax.f32 %v2111_v14, 0.0  ;;  %v2959_v14 = vld [vmem:[#allocation2 + $0x78] sm:$0xff] }
 0x30b   : > { %2786 = vmatmul.msk.bf16.gmra.mxu2 %vm1381_vm9, %v2956_v52 }
 0x30c   : > { %v2003_v30 = vpop.f32.mrf.mxu3 }
 0x30d   : > { %v2076_v32 = vadd.f32 %v2003_v30, %v1705_v8  ;;  %v1469_v8 = vpop.f32.mrf.mxu1 }
 0x30e   : > { %v1712_v31 = vpop.f32.mrf.mxu2 }
 0x30f   : > { %v2112_v40 = vadd.f32 %v3918_v22, %v2076_v32  ;;  %v1456_v41 = vpop.f32.mrf.mxu0  ;;  %v1713_v44 = vadd.f32 %v1712_v31, %v1459_v58 }
 0x310   : > { %v1710_v37 = vadd.f32 %v1709_v51, %v1456_v41 }
 0x311   : > { %v2144_v23 = vmax.f32 %v2112_v40, 0.0  ;;  %2901 = vmatmul.msk.bf16.gmra.mxu3 %vm1381_vm9, %v2999_v5 }
 0x313   : > { %v2173_v10 = vpack.c.bf16 %v2144_v23, %v2143_v38  ;;  %v3002_v38 = vld [vmem:[#allocation2 + $0x80] sm:$0xff] }
 0x314   : > { %v2006_v50 = vpop.f32.mrf.mxu3 }
 0x315   : > { %2916 = vmatmul.msk.bf16.gmra.mxu1 %vm943_vm5, %v2173_v10  ;;  %v2077_v43 = vadd.f32 %v2006_v50, %v1708_v3  ;;  %v1471_v50 = vpop.f32.mrf.mxu1 }
 0x316   : > { %v1714_v45 = vpop.f32.mrf.mxu2 }
 0x317   : > { %v2113_v35 = vadd.f32 %v3918_v22, %v2077_v43  ;;  %v1715_v28 = vadd.f32 %v1714_v45, %v1461_v33 }
 0x319   : > { %v2145_v46 = vmax.f32 %v2113_v35, 0.0 }
 0x31b   : > { %2787 = vmatmul.msk.bf16.gmra.mxu2 %vm1381_vm9, %v2957_v1 }
 0x31c   : > { %v2008_v9 = vpop.f32.mrf.mxu3 }
 0x31d   : > { %v2078_v18 = vadd.f32 %v2008_v9, %v1710_v37  ;;  %v1474_v37 = vpop.f32.mrf.mxu1 }
 0x31e   : > { %v1717_v39 = vpop.f32.mrf.mxu2 }
 0x31f   : > { %v2114_v42 = vadd.f32 %v3918_v22, %v2078_v18  ;;  %v1718_v52 = vadd.f32 %v1717_v39, %v1464_v49  ;;  %v3003_v39 = vld [vmem:[#allocation2 + $0x88] sm:$0xff] }
 0x321   : > { %v2146_v56 = vmax.f32 %v2114_v42, 0.0  ;;  %2902 = vmatmul.msk.bf16.gmra.mxu3 %vm1381_vm9, %v3000_v34 }
 0x323   : > { %v2174_v19 = vpack.c.bf16 %v2146_v56, %v2145_v46 }
 0x324   : > { %v2011_v29 = vpop.f32.mrf.mxu3 }
 0x325   : > { %2917 = vmatmul.msk.bf16.gmra.mxu1 %vm943_vm5, %v2174_v19  ;;  %v2079_v24 = vadd.f32 %v2011_v29, %v1713_v44  ;;  %v1476_v29 = vpop.f32.mrf.mxu1 }
 0x326   : > { %v1719_v63 = vpop.f32.mrf.mxu2 }
 0x327   : > { %v2115_v60 = vadd.f32 %v3918_v22, %v2079_v24  ;;  %v1720_v32 = vadd.f32 %v1719_v63, %v1466_v61 }
 0x329   : > { %v2147_v25 = vmax.f32 %v2115_v60, 0.0 }
 0x32b   : > { %2788 = vmatmul.msk.bf16.gmra.mxu2 %vm1381_vm9, %v2958_v17 }
 0x32c   : > { %v2013_v59 = vpop.f32.mrf.mxu3 }
 0x32d   : > { %v2080_v47 = vadd.f32 %v2013_v59, %v1715_v28 }
 0x32e   : > { %v1722_v7 = vpop.f32.mrf.mxu2 }
 0x32f   : > { %v2116_v62 = vadd.f32 %v3918_v22, %v2080_v47  ;;  %v1723_v43 = vadd.f32 %v1722_v7, %v1469_v8  ;;  %v1479_v7 = vpop.f32.mrf.mxu1 }
 0x331   : > { %v2148_v48 = vmax.f32 %v2116_v62, 0.0  ;;  %2903 = vmatmul.msk.bf16.gmra.mxu3 %vm1381_vm9, %v3001_v0 }
 0x333   : > { %v2175_v51 = vpack.c.bf16 %v2148_v48, %v2147_v25 }
 0x334   : > { %v2016_v13 = vpop.f32.mrf.mxu3 }
 0x335   : > { %2918 = vmatmul.msk.bf16.gmra.mxu1 %vm943_vm5, %v2175_v51  ;;  %v2081_v30 = vadd.f32 %v2016_v13, %v1718_v52 }
 0x336   : > { %v1724_v16 = vpop.f32.mrf.mxu2 }
 0x337   : > { %v2117_v31 = vadd.f32 %v3918_v22, %v2081_v30  ;;  %v1725_v33 = vadd.f32 %v1724_v16, %v1471_v50  ;;  %v1481_v52 = vpop.f32.mrf.mxu1 }
 0x339   : > { %v2149_v23 = vmax.f32 %v2117_v31, 0.0 }
 0x33b   : > { %2789 = vmatmul.msk.bf16.gmra.mxu2 %vm1381_vm9, %v2959_v14 }
 0x33c   : > { %v2018_v26 = vpop.f32.mrf.mxu3 }
 0x33d   : > { %v2082_v40 = vadd.f32 %v2018_v26, %v1720_v32 }
 0x33e   : > { %v1727_v5 = vpop.f32.mrf.mxu2 }
 0x33f   : > { %v2118_v58 = vadd.f32 %v3918_v22, %v2082_v40  ;;  %v1728_v44 = vadd.f32 %v1727_v5, %v1474_v37  ;;  %v3962_v40 = vld [vmem:[%s4140_s6] ss:$0 sm:$0xff] }
 0x341   : > { %v2150_v10 = vmax.f32 %v2118_v58, 0.0  ;;  %2904 = vmatmul.msk.bf16.gmra.mxu3 %vm1381_vm9, %v3002_v38 }
 0x343   : > { %v2176_v45 = vpack.c.bf16 %v2150_v10, %v2149_v23 }
 0x344   : > { %v2021_v3 = vpop.f32.mrf.mxu3 }
 0x345   : > { %2919 = vmatmul.msk.bf16.gmra.mxu1 %vm943_vm5, %v2176_v45  ;;  %v2083_v1 = vadd.f32 %v2021_v3, %v1723_v43  ;;  %v3087_v45 = vld [vmem:[%s3356_s16] sm:$0xff] }
 0x346   : > { %v1729_v41 = vpop.f32.mrf.mxu2 }
 0x347   : > { %v2119_v35 = vadd.f32 %v3918_v22, %v2083_v1  ;;  %v1730_v17 = vadd.f32 %v1729_v41, %v1476_v29 }
 0x349   : > { %v2151_v46 = vmax.f32 %v2119_v35, 0.0 }
 0x34c   : > { %v2023_v9 = vpop.f32.mrf.mxu3 }
 0x34d   : > { %v2084_v18 = vadd.f32 %v2023_v9, %v1725_v33 }
 0x34e   : > { %v1732_v42 = vpop.f32.mrf.mxu2 }
 0x34f   : > { %v2120_v34 = vadd.f32 %v3918_v22, %v2084_v18  ;;  %v1733_v13 = vadd.f32 %v1732_v42, %v1479_v7  ;;  %v3088_v42 = vld [vmem:[%s3356_s16 + $0x8] sm:$0xff] }
 0x351   : > { %v2152_v56 = vmax.f32 %v2120_v34, 0.0  ;;  %2905 = vmatmul.msk.bf16.gmra.mxu3 %vm1381_vm9, %v3003_v39 }
 0x353   : > { %v2177_v19 = vpack.c.bf16 %v2152_v56, %v2151_v46 }
 0x354   : > { %v2026_v49 = vpop.f32.mrf.mxu3 }
 0x355   : > { %2920 = vmatmul.msk.bf16.gmra.mxu1 %vm943_vm5, %v2177_v19  ;;  %v2085_v24 = vadd.f32 %v2026_v49, %v1728_v44 }
 0x356   : > { %v1734_v63 = vpop.f32.mrf.mxu2 }
 0x357   : > { %v2121_v59 = vadd.f32 %v3918_v22, %v2085_v24  ;;  %v1735_v8 = vadd.f32 %v1734_v63, %v1481_v52 }
 0x359   : > { %v2153_v62 = vmax.f32 %v2121_v59, 0.0 }
 0x35c   : > { %v2028_v28 = vpop.f32.mrf.mxu3 }
 0x35d   : > { %v2086_v60 = vadd.f32 %v2028_v28, %v1730_v17  ;;  %v3089_v17 = vld [vmem:[%s3356_s16 + $0x10] sm:$0xff] }
 0x35e   : > { %v1737_v47 = vpop.f32.mrf.mxu2 }
 0x35f   : > { %v2122_v61 = vadd.f32 %v3918_v22, %v2086_v60  ;;  %v1738_v43 = vadd.f32 %v1737_v47, %v3859_v55 }
 0x361   : > { %v2154_v0 = vmax.f32 %v2122_v61, 0.0 }
 0x363   : > { %v2178_v25 = vpack.c.bf16 %v2154_v0, %v2153_v62 }
 0x364   : > { %v2031_v48 = vpop.f32.mrf.mxu3 }
 0x365   : > { %2921 = vmatmul.msk.bf16.gmra.mxu1 %vm943_vm5, %v2178_v25  ;;  %v2087_v16 = vadd.f32 %v2031_v48, %v1733_v13 }
 0x366   : > { %v1739_v51 = vpop.f32.mrf.mxu2 }
 0x367   : > { %v2123_v14 = vadd.f32 %v3918_v22, %v2087_v16  ;;  %v1740_v9 = vadd.f32 %v1739_v51, %v3866_v57  ;;  %v3090_v51 = vld [vmem:[%s3356_s16 + $0x18] sm:$0xff] }
 0x369   : > { %v2155_v5 = vmax.f32 %v2123_v14, 0.0 }
 0x36c   : > { %v2033_v30 = vpop.f32.mrf.mxu3 }
 0x36d   : > { %v2088_v32 = vadd.f32 %v2033_v30, %v1735_v8 }
 0x36e   : > { %v1742_v26 = vpop.f32.mrf.mxu2 }
 0x36f   : > { %v2124_v31 = vadd.f32 %v3918_v22, %v2088_v32  ;;  %v1743_v59 = vadd.f32 %v1742_v26, %v3869_v15 }
 0x371   : > { %v2156_v58 = vmax.f32 %v2124_v31, 0.0 }
 0x372   : > { %v2264_v38 = vpop.f32.mrf.mxu1 }
 0x373   : > { %v2179_v23 = vpack.c.bf16 %v2156_v58, %v2155_v5  ;;  %v2265_v10 = vadd.f32 %v3962_v40, %v2264_v38  ;;  %v3091_v5 = vld [vmem:[%s3356_s16 + $0x20] sm:$0xff] }
 0x374   : > { %v2036_v50 = vpop.f32.mrf.mxu3 }
 0x375   : > { %v2344_v3 = vadd.f32 %v3087_v45, %v2265_v10  ;;  %2922 = vmatmul.msk.bf16.gmra.mxu1 %vm943_vm5, %v2179_v23  ;;  %v2089_v33 = vadd.f32 %v2036_v50, %v1738_v43 }
 0x376   : > { %v1744_v41 = vpop.f32.mrf.mxu2 }
 0x377   : > { %v2376_v1 = vmax.f32 %v2344_v3, 0.0  ;;  %v2125_v39 = vadd.f32 %v3918_v22, %v2089_v33  ;;  %v1745_v62 = vadd.f32 %v1744_v41, %v3877_v54  ;;  %v3092_v33 = vld [vmem:[%s3356_s16 + $0x28] sm:$0xff] }
 0x379   : > { %2408 = vst [vmem:[%s3970_s17] sm:$0xff] %v2376_v1  ;;  %v2157_v49 = vmax.f32 %v2125_v39, 0.0 }
 0x37a   : > { %v2266_v37 = vpop.f32.mrf.mxu1 }
 0x37b   : > { %v2267_v35 = vadd.f32 %v3962_v40, %v2266_v37 }
 0x37c   : > { %v2038_v18 = vpop.f32.mrf.mxu3 }
 0x37d   : > { %v2345_v34 = vadd.f32 %v3088_v42, %v2267_v35  ;;  %v2090_v55 = vadd.f32 %v2038_v18, %v1740_v9 }
 0x37e   : > { %v1747_v46 = vpop.f32.mrf.mxu2 }
 0x37f   : > { %v2377_v56 = vmax.f32 %v2345_v34, 0.0  ;;  %v2126_v19 = vadd.f32 %v3918_v22, %v2090_v55  ;;  %v1748_v38 = vadd.f32 %v1747_v46, %v3880_v53  ;;  %v3093_v46 = vld [vmem:[%s3356_s16 + $0x30] sm:$0xff] }
 0x381   : > { %2409 = vst [vmem:[%s3970_s17 + $0x8] sm:$0xff] %v2377_v56  ;;  %v2158_v29 = vmax.f32 %v2126_v19, 0.0 }
 0x382   : > { %v2269_v63 = vpop.f32.mrf.mxu1 }
 0x383   : > { %v2180_v44 = vpack.c.bf16 %v2158_v29, %v2157_v49  ;;  %v2270_v57 = vadd.f32 %v3962_v40, %v2269_v63 }
 0x384   : > { %v2041_v24 = vpop.f32.mrf.mxu3 }
 0x385   : > { %v2346_v28 = vadd.f32 %v3089_v17, %v2270_v57  ;;  %2923 = vmatmul.msk.bf16.gmra.mxu1 %vm943_vm5, %v2180_v44  ;;  %v2091_v61 = vadd.f32 %v2041_v24, %v1743_v59  ;;  %v3094_v59 = vld [vmem:[%s3356_s16 + $0x38] sm:$0xff] }
 0x386   : > { %v1749_v47 = vpop.f32.mrf.mxu2 }
 0x387   : > { %v2378_v60 = vmax.f32 %v2346_v28, 0.0  ;;  %v2127_v48 = vadd.f32 %v3918_v22, %v2091_v61  ;;  %v1750_v45 = vadd.f32 %v1749_v47, %v3884_v21 }
 0x389   : > { %2410 = vst [vmem:[%s3970_s17 + $0x10] sm:$0xff] %v2378_v60  ;;  %v2159_v8 = vmax.f32 %v2127_v48, 0.0 }
 0x38a   : > { %v2271_v7 = vpop.f32.mrf.mxu1 }
 0x38b   : > { %v2272_v0 = vadd.f32 %v3962_v40, %v2271_v7 }
 0x38c   : > { %v2043_v25 = vpop.f32.mrf.mxu3 }
 0x38d   : > { %v2347_v13 = vadd.f32 %v3090_v51, %v2272_v0  ;;  %v2092_v16 = vadd.f32 %v2043_v25, %v1745_v62 }
 0x38e   : > { %v1752_v14 = vpop.f32.mrf.mxu2 }
 0x38f   : > { %v2379_v52 = vmax.f32 %v2347_v13, 0.0  ;;  %v2128_v15 = vadd.f32 %v3918_v22, %v2092_v16  ;;  %v1753_v49 = vadd.f32 %v1752_v14, %v3887_v20  ;;  %v3095_v13 = vld [vmem:[%s3356_s16 + $0x40] sm:$0xff] }
 0x391   : > { %2411 = vst [vmem:[%s3970_s17 + $0x18] sm:$0xff] %v2379_v52  ;;  %v2160_v30 = vmax.f32 %v2128_v15, 0.0 }
 0x392   : > { %v2274_v32 = vpop.f32.mrf.mxu1 }
 0x393   : > { %v2181_v26 = vpack.c.bf16 %v2160_v30, %v2159_v8  ;;  %v2275_v54 = vadd.f32 %v3962_v40, %v2274_v32 }
 0x394   : > { %v2046_v31 = vpop.f32.mrf.mxu3 }
 0x395   : > { %v2348_v58 = vadd.f32 %v3091_v5, %v2275_v54  ;;  %2924 = vmatmul.msk.bf16.gmra.mxu1 %vm943_vm5, %v2181_v26  ;;  %v2093_v10 = vadd.f32 %v2046_v31, %v1748_v38  ;;  %v3096_v5 = vld [vmem:[%s3356_s16 + $0x48] sm:$0xff] }
 0x396   : > { %v1754_v41 = vpop.f32.mrf.mxu2 }
 0x397   : > { %v2380_v23 = vmax.f32 %v2348_v58, 0.0  ;;  %v2129_v1 = vadd.f32 %v3918_v22, %v2093_v10  ;;  %v1755_v57 = vadd.f32 %v1754_v41, %v3894_v12 }
 0x399   : > { %2412 = vst [vmem:[%s3970_s17 + $0x20] sm:$0xff] %v2380_v23  ;;  %v2161_v18 = vmax.f32 %v2129_v1, 0.0  ;;  %v3097_v1 = vld [vmem:[%s3356_s16 + $0x50] sm:$0xff] }
 0x39a   : > { %v2276_v50 = vpop.f32.mrf.mxu1 }
 0x39b   : > { %v2277_v3 = vadd.f32 %v3962_v40, %v2276_v50 }
 0x39c   : > { %v2048_v43 = vpop.f32.mrf.mxu3 }
 0x39d   : > { %v2349_v37 = vadd.f32 %v3092_v33, %v2277_v3  ;;  %v2094_v9 = vadd.f32 %v2048_v43, %v1750_v45 }
 0x39e   : > { %v1757_v19 = vpop.f32.mrf.mxu2 }
 0x39f   : > { %v2381_v35 = vmax.f32 %v2349_v37, 0.0  ;;  %v2130_v53 = vadd.f32 %v3918_v22, %v2094_v9  ;;  %v1758_v52 = vadd.f32 %v1757_v19, %v3897_v4 }
 0x3a1   : > { %2413 = vst [vmem:[%s3970_s17 + $0x28] sm:$0xff] %v2381_v35  ;;  %v2162_v39 = vmax.f32 %v2130_v53, 0.0 }
 0x3a2   : > { %v2279_v42 = vpop.f32.mrf.mxu1 }
 0x3a3   : > { %v2182_v34 = vpack.c.bf16 %v2162_v39, %v2161_v18  ;;  %v2280_v21 = vadd.f32 %v3962_v40, %v2279_v42 }
 0x3a4   : > { %v2051_v55 = vpop.f32.mrf.mxu3 }
 0x3a5   : > { %v2350_v56 = vadd.f32 %v3093_v46, %v2280_v21  ;;  %2925 = vmatmul.msk.bf16.gmra.mxu1 %vm943_vm5, %v2182_v34  ;;  %v2095_v63 = vadd.f32 %v2051_v55, %v1753_v49  ;;  %v3098_v21 = vld [vmem:[%s3356_s16 + $0x58] sm:$0xff] }
 0x3a6   : > { %v1759_v7 = vpop.f32.mrf.mxu2 }
 0x3a7   : > { %v2382_v29 = vmax.f32 %v2350_v56, 0.0  ;;  %v2131_v28 = vadd.f32 %v3918_v22, %v2095_v63  ;;  %v1760_v32 = vadd.f32 %v1759_v7, %v3900_v6 }
 0x3a9   : > { %2414 = vst [vmem:[%s3970_s17 + $0x30] sm:$0xff] %v2382_v29  ;;  %v2163_v62 = vmax.f32 %v2131_v28, 0.0 }
 0x3aa   : > { %v2281_v44 = vpop.f32.mrf.mxu1 }
 0x3ab   : > { %v2282_v24 = vadd.f32 %v3962_v40, %v2281_v44 }
 0x3ac   : > { %v2053_v17 = vpop.f32.mrf.mxu3 }
 0x3ad   : > { %v2351_v60 = vadd.f32 %v3094_v59, %v2282_v24  ;;  %v2096_v47 = vadd.f32 %v2053_v17, %v1755_v57  ;;  %v3099_v24 = vld [vmem:[%s3356_s16 + $0x60] sm:$0xff] }
 0x3ae   : > { %v1762_v30 = vpop.f32.mrf.mxu2 }
 0x3af   : > { %v2383_v61 = vmax.f32 %v2351_v60, 0.0  ;;  %v2132_v20 = vadd.f32 %v3918_v22, %v2096_v47  ;;  %v1763_v37 = vadd.f32 %v1762_v30, %v3903_v27 }
 0x3b1   : > { %2415 = vst [vmem:[%s3970_s17 + $0x38] sm:$0xff] %v2383_v61  ;;  %v2164_v0 = vmax.f32 %v2132_v20, 0.0 }
 0x3b2   : > { %v2284_v25 = vpop.f32.mrf.mxu1 }
 0x3b3   : > { %v2183_v48 = vpack.c.bf16 %v2164_v0, %v2163_v62  ;;  %v2285_v12 = vadd.f32 %v3962_v40, %v2284_v25  ;;  %v3100_v25 = vld [vmem:[%s3356_s16 + $0x68] sm:$0xff] }
 0x3b4   : > { %v2056_v51 = vpop.f32.mrf.mxu3 }
 0x3b5   : > { %v2352_v16 = vadd.f32 %v3095_v13, %v2285_v12  ;;  %2926 = vmatmul.msk.bf16.gmra.mxu1 %vm943_vm5, %v2183_v48  ;;  %v2097_v8 = vadd.f32 %v2056_v51, %v1758_v52 }
 0x3b6   : > { %v1764_v41 = vpop.f32.mrf.mxu2 }
 0x3b7   : > { %v2384_v15 = vmax.f32 %v2352_v16, 0.0  ;;  %v2133_v31 = vadd.f32 %v3918_v22, %v2097_v8  ;;  %v1765_v18 = vadd.f32 %v1764_v41, %v3906_v2  ;;  %v3101_v8 = vld [vmem:[%s3356_s16 + $0x70] sm:$0xff] }
 0x3b9   : > { %2416 = vst [vmem:[%s3970_s17 + $0x40] sm:$0xff] %v2384_v15  ;;  %v2165_v10 = vmax.f32 %v2133_v31, 0.0 }
 0x3ba   : > { %v2286_v14 = vpop.f32.mrf.mxu1 }
 0x3bb   : > { %v2287_v26 = vadd.f32 %v3962_v40, %v2286_v14 }
 0x3bc   : > { %v2058_v54 = vpop.f32.mrf.mxu3 }
 0x3bd   : > { %v2353_v58 = vadd.f32 %v3096_v5, %v2287_v26  ;;  %v2098_v38 = vadd.f32 %v2058_v54, %v1760_v32  ;;  %v3102_v26 = vld [vmem:[%s3356_s16 + $0x78] sm:$0xff] }
 0x3be   : > { %v1767_v56 = vpop.f32.mrf.mxu2 }
 0x3bf   : > { %v2385_v23 = vmax.f32 %v2353_v58, 0.0  ;;  %v2134_v4 = vadd.f32 %v3918_v22, %v2098_v38  ;;  %v1768_v28 = vadd.f32 %v1767_v56, %v3909_v11  ;;  %v3103_v38 = vld [vmem:[%s3356_s16 + $0x80] sm:$0xff] }
 0x3c1   : > { %2417 = vst [vmem:[%s3970_s17 + $0x48] sm:$0xff] %v2385_v23  ;;  %v2166_v50 = vmax.f32 %v2134_v4, 0.0 }
 0x3c2   : > { %v2289_v45 = vpop.f32.mrf.mxu1 }
 0x3c3   : > { %v2184_v3 = vpack.c.bf16 %v2166_v50, %v2165_v10  ;;  %v2290_v6 = vadd.f32 %v3962_v40, %v2289_v45  ;;  %v3104_v45 = vld [vmem:[%s3356_s16 + $0x88] sm:$0xff] }
 0x3c4   : > { %v2061_v43 = vpop.f32.mrf.mxu3 }
 0x3c5   : > { %v2354_v33 = vadd.f32 %v3097_v1, %v2290_v6  ;;  %2927 = vmatmul.msk.bf16.gmra.mxu1 %vm943_vm5, %v2184_v3  ;;  %v2099_v35 = vadd.f32 %v2061_v43, %v1763_v37  ;;  %v3105_v1 = vld [vmem:[%s3356_s16 + $0x90] sm:$0xff] }
 0x3c6   : > { %v1769_v60 = vpop.f32.mrf.mxu2 }
 0x3c7   : > { %v2386_v9 = vmax.f32 %v2354_v33, 0.0  ;;  %v2135_v34 = vadd.f32 %v3918_v22, %v2099_v35  ;;  %v1770_v20 = vadd.f32 %v1769_v60, %v3912_v36 }
 0x3c9   : > { %2418 = vst [vmem:[%s3970_s17 + $0x50] sm:$0xff] %v2386_v9  ;;  %v2167_v49 = vmax.f32 %v2135_v34, 0.0 }
 0x3ca   : > { %v2291_v53 = vpop.f32.mrf.mxu1 }
 0x3cb   : > { %v2292_v39 = vadd.f32 %v3962_v40, %v2291_v53  ;;  %v3106_v53 = vld [vmem:[%s3356_s16 + $0x98] sm:$0xff] }
 0x3cc   : > { %v2063_v42 = vpop.f32.mrf.mxu3 }
 0x3cd   : > { %v2355_v55 = vadd.f32 %v3098_v21, %v2292_v39  ;;  %v2100_v46 = vadd.f32 %v2063_v42, %v1765_v18  ;;  %v3107_v21 = vld [vmem:[%s3356_s16 + $0xa0] sm:$0xff] }
 0x3cf   : > { %v2387_v19 = vmax.f32 %v2355_v55, 0.0  ;;  %v2136_v27 = vadd.f32 %v3918_v22, %v2100_v46 }
 0x3d1   : > { %2419 = vst [vmem:[%s3970_s17 + $0x58] sm:$0xff] %v2387_v19  ;;  %v2168_v29 = vmax.f32 %v2136_v27, 0.0  ;;  %v3108_v27 = vld [vmem:[%s3356_s16 + $0xa8] sm:$0xff] }
 0x3d2   : > { %v2294_v63 = vpop.f32.mrf.mxu1 }
 0x3d3   : > { %v2185_v44 = vpack.c.bf16 %v2168_v29, %v2167_v49  ;;  %v2295_v2 = vadd.f32 %v3962_v40, %v2294_v63 }
 0x3d4   : > { %v2066_v57 = vpop.f32.mrf.mxu3 }
 0x3d5   : > { %v2356_v17 = vadd.f32 %v3099_v24, %v2295_v2  ;;  %2928 = vmatmul.msk.bf16.gmra.mxu1 %vm943_vm5, %v2185_v44  ;;  %v2101_v47 = vadd.f32 %v2066_v57, %v1768_v28  ;;  %v3109_v2 = vld [vmem:[%s3356_s16 + $0xb0] sm:$0xff] }
 0x3d7   : > { %v2388_v59 = vmax.f32 %v2356_v17, 0.0  ;;  %v2137_v0 = vadd.f32 %v3918_v22, %v2101_v47 }
 0x3d9   : > { %2420 = vst [vmem:[%s3970_s17 + $0x60] sm:$0xff] %v2388_v59  ;;  %v2169_v13 = vmax.f32 %v2137_v0, 0.0  ;;  %v3110_v59 = vld [vmem:[%s3356_s16 + $0xb8] sm:$0xff] }
 0x3da   : > { %v2296_v61 = vpop.f32.mrf.mxu1 }
 0x3db   : > { %v2297_v7 = vadd.f32 %v3962_v40, %v2296_v61 }
 0x3dc   : > { %v2068_v62 = vpop.f32.mrf.mxu3 }
 0x3dd   : > { %v2357_v48 = vadd.f32 %v3100_v25, %v2297_v7  ;;  %v2102_v12 = vadd.f32 %v2068_v62, %v1770_v20  ;;  %v3111_v7 = vld [vmem:[%s3356_s16 + $0xc0] sm:$0xff] }
 0x3df   : > { %v2389_v11 = vmax.f32 %v2357_v48, 0.0  ;;  %v2138_v51 = vadd.f32 %v3918_v22, %v2102_v12  ;;  %v3112_v12 = vld [vmem:[%s3356_s16 + $0xc8] sm:$0xff] }
 0x3e1   : > { %2421 = vst [vmem:[%s3970_s17 + $0x68] sm:$0xff] %v2389_v11  ;;  %v2170_v16 = vmax.f32 %v2138_v51, 0.0 }
 0x3e2   : > { %v2299_v52 = vpop.f32.mrf.mxu1 }
 0x3e3   : > { %v2186_v36 = vpack.c.bf16 %v2170_v16, %v2169_v13  ;;  %v2300_v15 = vadd.f32 %v3962_v40, %v2299_v52  ;;  %v3113_v52 = vld [vmem:[%s3356_s16 + $0xd0] sm:$0xff] }
 0x3e5   : > { %v2358_v30 = vadd.f32 %v3101_v8, %v2300_v15  ;;  %2929 = vmatmul.msk.bf16.gmra.mxu1 %vm943_vm5, %v2186_v36 }
 0x3e7   : > { %v2390_v14 = vmax.f32 %v2358_v30, 0.0 }
 0x3e9   : > { %2422 = vst [vmem:[%s3970_s17 + $0x70] sm:$0xff] %v2390_v14  ;;  %v3114_v14 = vld [vmem:[%s3356_s16 + $0xd8] sm:$0xff] }
 0x3ea   : > { %v2301_v32 = vpop.f32.mrf.mxu1 }
 0x3eb   : > { %v2302_v22 = vadd.f32 %v3962_v40, %v2301_v32 }
 0x3ed   : > { %v2359_v54 = vadd.f32 %v3102_v26, %v2302_v22 }
 0x3ef   : > { %v2391_v31 = vmax.f32 %v2359_v54, 0.0 }
 0x3f1   : > { %2423 = vst [vmem:[%s3970_s17 + $0x78] sm:$0xff] %v2391_v31  ;;  %v3115_v31 = vld [vmem:[%s3356_s16 + $0xe0] sm:$0xff] }
 0x3f2   : > { %v2304_v5 = vpop.f32.mrf.mxu1 }
 0x3f3   : > { %v2305_v58 = vadd.f32 %v3962_v40, %v2304_v5 }
 0x3f5   : > { %v2360_v23 = vadd.f32 %v3103_v38, %v2305_v58 }
 0x3f7   : > { %v2392_v4 = vmax.f32 %v2360_v23, 0.0 }
 0x3f9   : > { %2424 = vst [vmem:[%s3970_s17 + $0x80] sm:$0xff] %v2392_v4  ;;  %v3116_v4 = vld [vmem:[%s3356_s16 + $0xe8] sm:$0xff] }
 0x3fa   : > { %v2306_v10 = vpop.f32.mrf.mxu1 }
 0x3fb   : > { %v2307_v50 = vadd.f32 %v3962_v40, %v2306_v10 }
 0x3fd   : > { %v2361_v3 = vadd.f32 %v3104_v45, %v2307_v50 }
 0x3ff   : > { %v2393_v6 = vmax.f32 %v2361_v3, 0.0 }
 0x401   : > { %2425 = vst [vmem:[%s3970_s17 + $0x88] sm:$0xff] %v2393_v6  ;;  %v3117_v6 = vld [vmem:[%s3356_s16 + $0xf0] sm:$0xff] }
 0x402   : > { %v2309_v41 = vpop.f32.mrf.mxu1 }
 0x403   : > { %v2310_v43 = vadd.f32 %v3962_v40, %v2309_v41 }
 0x405   : > { %v2362_v33 = vadd.f32 %v3105_v1, %v2310_v43 }
 0x407   : > { %v2394_v37 = vmax.f32 %v2362_v33, 0.0 }
 0x409   : > { %2426 = vst [vmem:[%s3970_s17 + $0x90] sm:$0xff] %v2394_v37  ;;  %v3118_v37 = vld [vmem:[%s3356_s16 + $0xf8] sm:$0xff] }
 0x40a   : > { %v2311_v9 = vpop.f32.mrf.mxu1 }
 0x40b   : > { %v2312_v35 = vadd.f32 %v3962_v40, %v2311_v9 }
 0x40d   : > { %v2363_v18 = vadd.f32 %v3106_v53, %v2312_v35 }
 0x40f   : > { %v2395_v39 = vmax.f32 %v2363_v18, 0.0 }
 0x411   : > { %2427 = vst [vmem:[%s3970_s17 + $0x98] sm:$0xff] %v2395_v39 }
 0x412   : > { %v2314_v42 = vpop.f32.mrf.mxu1 }
 0x413   : > { %v2315_v34 = vadd.f32 %v3962_v40, %v2314_v42 }
 0x415   : > { %v2364_v55 = vadd.f32 %v3107_v21, %v2315_v34 }
 0x417   : > { %v2396_v46 = vmax.f32 %v2364_v55, 0.0 }
 0x419   : > { %2428 = vst [vmem:[%s3970_s17 + $0xa0] sm:$0xff] %v2396_v46 }
 0x41a   : > { %v2316_v56 = vpop.f32.mrf.mxu1 }
 0x41b   : > { %v2317_v19 = vadd.f32 %v3962_v40, %v2316_v56 }
 0x41d   : > { %v2365_v49 = vadd.f32 %v3108_v27, %v2317_v19 }
 0x41f   : > { %v2397_v29 = vmax.f32 %v2365_v49, 0.0 }
 0x421   : > { %2429 = vst [vmem:[%s3970_s17 + $0xa8] sm:$0xff] %v2397_v29 }
 0x422   : > { %v2319_v63 = vpop.f32.mrf.mxu1 }
 0x423   : > { %v2320_v44 = vadd.f32 %v3962_v40, %v2319_v63 }
 0x425   : > { %v2366_v57 = vadd.f32 %v3109_v2, %v2320_v44 }
 0x427   : > { %v2398_v24 = vmax.f32 %v2366_v57, 0.0 }
 0x429   : > { %2430 = vst [vmem:[%s3970_s17 + $0xb0] sm:$0xff] %v2398_v24 }
 0x42a   : > { %v2321_v17 = vpop.f32.mrf.mxu1 }
 0x42b   : > { %v2322_v28 = vadd.f32 %v3962_v40, %v2321_v17 }
 0x42d   : > { %v2367_v60 = vadd.f32 %v3110_v59, %v2322_v28 }
 0x42f   : > { %v2399_v47 = vmax.f32 %v2367_v60, 0.0 }
 0x431   : > { %2431 = vst [vmem:[%s3970_s17 + $0xb8] sm:$0xff] %v2399_v47 }
 0x432   : > { %v2324_v61 = vpop.f32.mrf.mxu1 }
 0x433   : > { %v2325_v20 = vadd.f32 %v3962_v40, %v2324_v61 }
 0x435   : > { %v2368_v62 = vadd.f32 %v3111_v7, %v2325_v20 }
 0x437   : > { %v2400_v0 = vmax.f32 %v2368_v62, 0.0 }
 0x439   : > { %2432 = vst [vmem:[%s3970_s17 + $0xc0] sm:$0xff] %v2400_v0 }
 0x43a   : > { %v2326_v25 = vpop.f32.mrf.mxu1 }
 0x43b   : > { %v2327_v48 = vadd.f32 %v3962_v40, %v2326_v25 }
 0x43d   : > { %v2369_v11 = vadd.f32 %v3112_v12, %v2327_v48 }
 0x43f   : > { %v2401_v51 = vmax.f32 %v2369_v11, 0.0 }
 0x441   : > { %2433 = vst [vmem:[%s3970_s17 + $0xc8] sm:$0xff] %v2401_v51 }
 0x442   : > { %v2329_v13 = vpop.f32.mrf.mxu1 }
 0x443   : > { %v2330_v16 = vadd.f32 %v3962_v40, %v2329_v13 }
 0x445   : > { %v2370_v36 = vadd.f32 %v3113_v52, %v2330_v16 }
 0x447   : > { %v2402_v15 = vmax.f32 %v2370_v36, 0.0 }
 0x449   : > { %2434 = vst [vmem:[%s3970_s17 + $0xd0] sm:$0xff] %v2402_v15 }
 0x44a   : > { %v2331_v8 = vpop.f32.mrf.mxu1 }
 0x44b   : > { %v2332_v30 = vadd.f32 %v3962_v40, %v2331_v8 }
 0x44d   : > { %v2371_v32 = vadd.f32 %v3114_v14, %v2332_v30 }
 0x44f   : > { %v2403_v22 = vmax.f32 %v2371_v32, 0.0 }
 0x451   : > { %2435 = vst [vmem:[%s3970_s17 + $0xd8] sm:$0xff] %v2403_v22 }
 0x452   : > { %v2334_v26 = vpop.f32.mrf.mxu1 }
 0x453   : > { %v2335_v54 = vadd.f32 %v3962_v40, %v2334_v26 }
 0x455   : > { %v2372_v5 = vadd.f32 %v3115_v31, %v2335_v54 }
 0x457   : > { %v2404_v58 = vmax.f32 %v2372_v5, 0.0 }
 0x459   : > { %2436 = vst [vmem:[%s3970_s17 + $0xe0] sm:$0xff] %v2404_v58 }
 0x45a   : > { %v2336_v38 = vpop.f32.mrf.mxu1 }
 0x45b   : > { %v2337_v23 = vadd.f32 %v3962_v40, %v2336_v38 }
 0x45d   : > { %v2373_v10 = vadd.f32 %v3116_v4, %v2337_v23 }
 0x45f   : > { %v2405_v50 = vmax.f32 %v2373_v10, 0.0 }
 0x461   : > { %2437 = vst [vmem:[%s3970_s17 + $0xe8] sm:$0xff] %v2405_v50 }
 0x462   : > { %v2339_v45 = vpop.f32.mrf.mxu1 }
 0x463   : > { %v2340_v3 = vadd.f32 %v3962_v40, %v2339_v45 }
 0x465   : > { %v2374_v41 = vadd.f32 %v3117_v6, %v2340_v3 }
 0x467   : > { %v2406_v43 = vmax.f32 %v2374_v41, 0.0 }
 0x469   : > { %2438 = vst [vmem:[%s3970_s17 + $0xf0] sm:$0xff] %v2406_v43 }
 0x46a   : > { %v2341_v1 = vpop.f32.mrf.mxu1 }
 0x46b   : > { %v2342_v33 = vadd.f32 %v3962_v40, %v2341_v1 }
 0x46d   : > { %v2375_v9 = vadd.f32 %v3118_v37, %v2342_v33 }
 0x46f   : > { %v2407_v35 = vmax.f32 %v2375_v9, 0.0 }
 0x471   : > { %2439 = vst [vmem:[%s3970_s17 + $0xf8] sm:$0xff] %v2407_v35 }
 0x472   : > { %3176 = shalt.err (!%p3173_p4)
}
 0x473   : > { %s3222_s22 = smov 128   ;;  %s3223_s16 = smov 8  }
 0x474   : > { %3033 = dma.vmem_to_hbm [thread:$0]  (%p3314_p11), %s2454_s20, 4096, %s2456_s9, %s2441_s21, %s3222_s22, %s3222_s22, %s3223_s16  }
 0x475 PF: > { %s2470_s17 = sand.u32 1, %s3203_s24   ;;  %p4152_p7 = scmp.ge.s32.totalorder %s3215_s27, 2 }
 0x476   : > { %s2471_s11 = scalar_lea.sflag [#allocation5], %s2470_s17 }
 0x477   : > { %p3040_p5 = pnand %p4152_p7, %p3318_p12 }
 0x479   : > { %p3041_p8 = pneg %p3040_p5 }
 0x47b   : > { %3198 = dma.done.wait (%p3041_p8), %s2471_s11, 4096  }
 0x47c   : > { %3200 = vsyncadd (%p3041_p8), %s2471_s11, 4294963200  ;;  %s4153_s12 = sld [smem:[#allocation9_spill]]  ;;  %p20_p10 = scmp.ge.s32.totalorder %s3289_s30, 4  }
 0x47d   : > { %s4154_s24 = smov %s3207_s25  ;;  %s4155_s25 = smov %s3211_s26 }
 0x47e   : > { %s4157_s27 = smov %s3289_s30  ;;  %22 = sbr.rel (!%p20_p10) target bundleno = 5 (0x5), region = 98 }
 0x482   : > { %s4156_s26 = smov %s4153_s12 }
 0x483   :  { %2477 = vsyncpa [#allocation4], 1 }
 0x484   :  { %2479 = vsyncpa [#allocation4 + $0x1], 1 }
 0x485   :  { %2480 = vsyncpa [#allocation5], 1 }
 0x486   :  { %2482 = vsyncpa [#allocation5 + $0x1], 1 }

</bundles_post_ra>
